<compile_context>
chip_gen: v7x
topology: tpu7x:2x2x1
jax: 0.10.0
libtpu: 0.0.40
codegen_flags: <defaults>
</compile_context>

<pallas_src>
import functools

import jax
import jax.numpy as jnp
from jax.experimental import pallas as pl
from jax.experimental.pallas import tpu as pltpu


def _round_up(x, m):
    return ((x + m - 1) // m) * m


# v5e's scoped-VMEM default is 16 MiB (v6e/v7x: 32 MiB); above this we must ask.
_SAFE_DEFAULT_SCOPED = 14 * 1024 * 1024


def _vmem_budget():
    """Usable per-step VMEM tile budget (bytes), generation aware."""
    try:
        cap = int(pltpu.get_tpu_info().vmem_capacity_bytes)
    except Exception:  # unknown backend / interpret mode
        cap = 64 * 1024 * 1024
    # Leave headroom for Mosaic internal scratch; never request all of v7x's 64 MiB.
    return min(48 * 1024 * 1024, (3 * cap) // 4)


# ----------------------------------------------------------------------------
# Fused path (stride == 1): im2col inside the kernel.
# ----------------------------------------------------------------------------
def _fused_conv_kernel(x_ref, w_ref, shift_ref, o_ref, *, kh, kw, Wp, Mrow, act, relu6):
    # x_ref:     (Hp*Wp, Cin)      bf16, one padded image (batch dim squeezed)
    # w_ref:     (kh*kw, Cin, tco) bf16, BN scale folded in
    # shift_ref: (1, tco)          f32 folded BN shift = beta - mean * scale
    # o_ref:     (Mrow, tco)       f32, Mrow = Ho*Wp rows (extra cols sliced off outside)
    acc = None
    for i in range(kh):
        for j in range(kw):
            off = i * Wp + j                                   # static offset
            lhs = x_ref[off:off + Mrow, :]                     # 2-D static slice, no reshape
            d = jnp.dot(lhs, w_ref[i * kw + j],
                        preferred_element_type=jnp.float32)
            acc = d if acc is None else acc + d
    y = acc + shift_ref[...]
    if act:
        y = jnp.maximum(y, 0.0)
        if relu6:
            y = jnp.minimum(y, 6.0)
    o_ref[...] = y


def _conv_bn_act_fused_s1(x_nhwc, w_oihw, scale, shift, *, padding, act, relu6,
                          Coutp, budget):
    """stride==1 fused conv; returns NHWC f32 or None if it does not fit VMEM."""
    N, H, W, Cin = x_nhwc.shape
    Cout, _, kh, kw = w_oihw.shape
    Ho = H + 2 * padding - kh + 1
    Wo = W + 2 * padding - kw + 1
    Wp = W + 2 * padding
    extra_h = 1 if kw > 1 else 0          # one extra zero row so tap slices never run off the end
    Hp = H + 2 * padding + extra_h
    R = Hp * Wp
    Mrow = Ho * Wp

    # Pick the Cout tile so image + weight + output (double-buffered) fit the budget.
    tco_cands = [Coutp] if Coutp <= 512 else [c for c in (512, 256, 128) if Coutp % c == 0]
    tco = None
    vmem_est = 0
    for cand in tco_cands:
        est = (2 * R * Cin * 2                   # double-buffered bf16 image
               + 2 * kh * kw * Cin * cand * 2    # double-buffered bf16 weight
               + 2 * Mrow * cand * 4             # double-buffered f32 output
               + Mrow * cand * 4                 # f32 accumulator value
               + 2 * Mrow * Cin * 2              # per-tap slice temporaries
               + (1 << 20))
        if est <= budget:
            tco, vmem_est = cand, est
            break
    if tco is None:
        return None                              # image too large: use im2col path

    xp = jnp.pad(x_nhwc, ((0, 0), (padding, padding + extra_h),
                          (padding, padding), (0, 0)))
    xflat = xp.reshape(N, R, Cin)                # trivial reshape, no copy

    w_all = jnp.transpose(w_oihw, (2, 3, 1, 0)).reshape(kh * kw, Cin, Cout)
    w_all = (w_all.astype(jnp.float32) * scale[None, None, :]).astype(jnp.bfloat16)
    w_all = jnp.pad(w_all, ((0, 0), (0, 0), (0, Coutp - Cout)))
    shift_row = jnp.pad(shift, (0, Coutp - Cout)).reshape(1, Coutp)

    gco = Coutp // tco
    cp_kwargs = dict(dimension_semantics=("parallel", "parallel"))
    if vmem_est > _SAFE_DEFAULT_SCOPED:
        cp_kwargs["vmem_limit_bytes"] = int(min(budget, vmem_est + vmem_est // 2))

    cost = pl.CostEstimate(
        flops=int(2 * N * Mrow * Cin * Coutp * kh * kw),
        transcendentals=0,
        bytes_accessed=int(xflat.size * 2 + N * w_all.size * 2
                           + shift_row.size * 4 + N * Mrow * Coutp * 4))

    out = pl.pallas_call(
        functools.partial(_fused_conv_kernel, kh=kh, kw=kw, Wp=Wp, Mrow=Mrow,
                          act=act, relu6=relu6),
        out_shape=jax.ShapeDtypeStruct((N, Mrow, Coutp), jnp.float32),
        grid_spec=pltpu.PrefetchScalarGridSpec(
            num_scalar_prefetch=0,
            grid=(N, gco),
            in_specs=[
                pl.BlockSpec((None, R, Cin), lambda n, co: (n, 0, 0)),        # padded image
                pl.BlockSpec((kh * kw, Cin, tco), lambda n, co: (0, 0, co)),  # scaled weight
                pl.BlockSpec((1, tco), lambda n, co: (0, co)),                # BN shift
            ],
            out_specs=pl.BlockSpec((None, Mrow, tco), lambda n, co: (n, 0, co)),
        ),
        compiler_params=pltpu.CompilerParams(**cp_kwargs),
        cost_estimate=cost,
    )(xflat, w_all, shift_row)

    # Drop the extra padded-width columns and the Cout lane padding (fuses with the
    # final NCHW transpose in the caller).
    return out.reshape(N, Ho, Wp, Coutp)[:, :, :Wo, :Cout]


# ----------------------------------------------------------------------------
# Fallback path (stride != 1, or fused path does not fit VMEM): im2col matmul.
# ----------------------------------------------------------------------------
def _im2col_kernel(p_ref, w_ref, shift_ref, o_ref, *, act, relu6):
    # p_ref: (tm, tk) bf16 patches; w_ref: (tk, Coutp) bf16 (scale folded);
    # shift_ref: (1, Coutp) f32; o_ref: (tm, Coutp) f32, resident across the k axis.
    k = pl.program_id(1)
    d = jnp.dot(p_ref[...], w_ref[...], preferred_element_type=jnp.float32)

    @pl.when(k == 0)
    def _():
        o_ref[...] = d                       # direct store: no zero-init pass

    @pl.when(k > 0)
    def _():
        o_ref[...] += d

    @pl.when(k == pl.num_programs(1) - 1)
    def _():
        y = o_ref[...] + shift_ref[...]
        if act:
            y = jnp.maximum(y, 0.0)
            if relu6:
                y = jnp.minimum(y, 6.0)
        o_ref[...] = y


def _conv_bn_act_im2col(x_nhwc, w_oihw, scale, shift, *, stride, padding, act, relu6,
                        Coutp, budget):
    """General-stride im2col + matmul path; returns NHWC f32."""
    N, H, W, Cin = x_nhwc.shape
    Cout, _, kh, kw = w_oihw.shape
    Ho = (H + 2 * padding - kh) // stride + 1
    Wo = (W + 2 * padding - kw) // stride + 1
    K = Cin * kh * kw
    M = N * Ho * Wo

    # im2col in bf16 (x was cast before padding -> all glue copies are half width).
    xp = jnp.pad(x_nhwc, ((0, 0), (padding, padding), (padding, padding), (0, 0)))
    taps = []
    for i in range(kh):
        for j in range(kw):
            taps.append(xp[:, i:i + Ho * stride:stride, j:j + Wo * stride:stride, :])
    patches = jnp.stack(taps, axis=3).reshape(M, K)              # (M, K) bf16

    w_mat = jnp.transpose(w_oihw, (2, 3, 1, 0)).reshape(K, Cout)  # matches patch K order
    w_mat = (w_mat.astype(jnp.float32) * scale[None, :]).astype(jnp.bfloat16)
    shift_row = jnp.pad(shift, (0, Coutp - Cout)).reshape(1, Coutp)

    # K tiling: keep the whole scaled weight resident (gk=1) whenever it fits;
    # otherwise use a large tk so the (tm, Coutp) accumulator is revisited rarely.
    if K * Coutp * 2 * 2 <= budget // 3:
        tk, K_pad = K, K
    else:
        tk = 512
        for cand in (2048, 1024):
            fits = 2 * cand * Coutp * 2 <= budget // 3
            waste_ok = (_round_up(K, cand) - K) * 4 <= K
            if fits and waste_ok:
                tk = cand
                break
        K_pad = _round_up(K, tk)

    # Row tile: prefer 512 (v7x: halves output VMEM vs 1024 at ~same roofline),
    # but reject candidates that waste >15% on padding or leave <8 pipeline steps.
    tm = 128
    for cand in (512, 256):
        M_cand = _round_up(M, cand)
        waste_ok = (M_cand - M) * 100 <= 15 * M
        steps_ok = M_cand // cand >= 8
        vmem_ok = (2 * cand * tk * 2 + 2 * tk * Coutp * 2
                   + 2 * cand * Coutp * 4 + (1 << 20)) <= budget
        if waste_ok and steps_ok and vmem_ok:
            tm = cand
            break
    M_pad = _round_up(M, tm)

    patches = jnp.pad(patches, ((0, M_pad - M), (0, K_pad - K)))
    w_mat = jnp.pad(w_mat, ((0, K_pad - K), (0, Coutp - Cout)))
    gm, gk = M_pad // tm, K_pad // tk

    vmem_est = (2 * tm * tk * 2 + 2 * tk * Coutp * 2 + 2 * tm * Coutp * 4
                + 2 * Coutp * 4 + (1 << 20))
    cp_kwargs = dict(dimension_semantics=("parallel", "arbitrary"))
    if vmem_est > _SAFE_DEFAULT_SCOPED:
        cp_kwargs["vmem_limit_bytes"] = int(min(budget, vmem_est + vmem_est // 2))

    cost = pl.CostEstimate(
        flops=int(2 * M * K * Cout),
        transcendentals=0,
        bytes_accessed=int(patches.size * 2 + gm * w_mat.size * 2
                           + shift_row.size * 4 + M_pad * Coutp * 4))

    out = pl.pallas_call(
        functools.partial(_im2col_kernel, act=act, relu6=relu6),
        out_shape=jax.ShapeDtypeStruct((M_pad, Coutp), jnp.float32),
        grid_spec=pltpu.PrefetchScalarGridSpec(
            num_scalar_prefetch=0,
            grid=(gm, gk),
            in_specs=[
                pl.BlockSpec((tm, tk), lambda i, k: (i, k)),       # patch tile
                pl.BlockSpec((tk, Coutp), lambda i, k: (k, 0)),    # scaled weight
                pl.BlockSpec((1, Coutp), lambda i, k: (0, 0)),     # BN shift
            ],
            out_specs=pl.BlockSpec((tm, Coutp), lambda i, k: (i, 0)),
        ),
        compiler_params=pltpu.CompilerParams(**cp_kwargs),
        cost_estimate=cost,
    )(patches, w_mat, shift_row)

    return out[:M, :Cout].reshape(N, Ho, Wo, Cout)


# ----------------------------------------------------------------------------
# Public entry point: ConvBNAct forward.
# ----------------------------------------------------------------------------
def conv_bn_act(x_nchw, weight, gamma, beta, running_mean, running_var,
                *, stride=1, padding=0, eps=1e-5, act=True, relu6=True):
    """Conv2d(bias=False, groups=1) + BatchNorm2d(eval) + ReLU6/ReLU.

    x_nchw: (N, Cin, H, W) f32; weight: (Cout, Cin, kh, kw). Returns NCHW f32.
    """
    N, Cin, H, W = x_nchw.shape
    Cout, Cin_w, kh, kw = weight.shape
    assert Cin == Cin_w, "groups != 1 not supported"  # TODO(synk): grouped/depthwise conv

    scale = (gamma / jnp.sqrt(running_var + eps)).astype(jnp.float32)   # (Cout,)
    shift = (beta - running_mean * scale).astype(jnp.float32)           # (Cout,)

    # NCHW -> NHWC and cast to bf16 *before* any padding/im2col so all glue HBM
    # traffic is half-width.  TODO(synk): keep the whole network NHWC (and let the
    # consumer take NHWC) to drop both layout transposes entirely.
    x = jnp.transpose(x_nchw, (0, 2, 3, 1)).astype(jnp.bfloat16)

    # Lane-dense output channels: 128-aligned, 256-aligned when large (v6e/v7x MXU).
    Coutp = _round_up(Cout, 256) if Cout > 128 else _round_up(Cout, 128)
    budget = _vmem_budget()

    out_nhwc = None
    if stride == 1:
        out_nhwc = _conv_bn_act_fused_s1(x, weight, scale, shift, padding=padding,
                                         act=act, relu6=relu6, Coutp=Coutp,
                                         budget=budget)
    if out_nhwc is None:
        # stride > 1 (or image too large for the fused path): im2col matmul.
        # TODO(synk): fuse strided im2col via manual band DMA for stride>1 as well.
        out_nhwc = _conv_bn_act_im2col(x, weight, scale, shift, stride=stride,
                                       padding=padding, act=act, relu6=relu6,
                                       Coutp=Coutp, budget=budget)

    return jnp.transpose(out_nhwc, (0, 3, 1, 2))   # back to NCHW (PyTorch layout)


# ----------------------------------------------------------------------------
# Reference + self-test
# ----------------------------------------------------------------------------
def _reference(x_nchw, weight, gamma, beta, running_mean, running_var,
               *, stride=1, padding=0, eps=1e-5):
    y = jax.lax.conv_general_dilated(
        x_nchw, weight, window_strides=(stride, stride),
        padding=[(padding, padding), (padding, padding)],
        dimension_numbers=("NCHW", "OIHW", "NCHW"))
    scale = gamma / jnp.sqrt(running_var + eps)
    shift = beta - running_mean * scale
    y = y * scale[None, :, None, None] + shift[None, :, None, None]
    return jnp.minimum(jnp.maximum(y, 0.0), 6.0)


if __name__ == "__main__":
    key = jax.random.PRNGKey(0)
    k0, k1, k2, k3, k4, k5 = jax.random.split(key, 6)

    # ConvBNAct(in_channels=4, out_channels=8, kernel_size=3, stride=1, padding=1)
    N, Cin, H, W = 2, 4, 16, 16
    Cout, kh, kw = 8, 3, 3

    x = jax.random.normal(k0, (N, Cin, H, W), dtype=jnp.float32)
    weight = 0.1 * jax.random.normal(k1, (Cout, Cin, kh, kw), dtype=jnp.float32)
    gamma = 1.0 + 0.1 * jax.random.normal(k2, (Cout,), dtype=jnp.float32)
    beta = 0.1 * jax.random.normal(k3, (Cout,), dtype=jnp.float32)
    running_mean = 0.1 * jax.random.normal(k4, (Cout,), dtype=jnp.float32)
    running_var = jnp.abs(1.0 + 0.1 * jax.random.normal(k5, (Cout,), dtype=jnp.float32))

    # stride=1, padding=1 -> fused im2col-in-kernel path.
    out1 = jax.block_until_ready(
        conv_bn_act(x, weight, gamma, beta, running_mean, running_var,
                    stride=1, padding=1))
    ref1 = _reference(x, weight, gamma, beta, running_mean, running_var,
                      stride=1, padding=1)
    assert out1.shape == ref1.shape == (N, Cout, H, W)
    # bf16 MXU inputs (f32 accumulation) -> slightly looser tolerance than pure f32.
    assert jnp.allclose(out1, ref1, atol=2e-2, rtol=2e-2), "fused path mismatch"

    # stride=2 -> im2col matmul fallback path.
    out2 = jax.block_until_ready(
        conv_bn_act(x, weight, gamma, beta, running_mean, running_var,
                    stride=2, padding=1))
    ref2 = _reference(x, weight, gamma, beta, running_mean, running_var,
                      stride=2, padding=1)
    assert out2.shape == ref2.shape == (N, Cout, 8, 8)
    assert jnp.allclose(out2, ref2, atol=2e-2, rtol=2e-2), "im2col path mismatch"

    print("KERNEL_OK")
</pallas_src>

<mosaic_0001>
module attributes {stable_mosaic.version = 11 : i64} {
  func.func @_fused_conv_kernel(%arg0: i32, %arg1: i32, %arg2: memref<1x342x4xbf16, #tpu.memory_space<vmem>>, %arg3: memref<9x4x128xbf16, #tpu.memory_space<vmem>>, %arg4: memref<1x128xf32, #tpu.memory_space<vmem>>, %arg5: memref<1x288x128xf32, #tpu.memory_space<vmem>>) attributes {dimension_semantics = [#tpu.dimension_semantics<parallel>, #tpu.dimension_semantics<parallel>], iteration_bounds = array<i64: 2, 1>, scalar_prefetch = 0 : i64, scratch_operands = 0 : i64, tpu.core_type = #tpu.core_type<tc>, window_params = [{transform_indices = @transform_0, window_bounds = array<i64: 1, 342, 4>}, {transform_indices = @transform_1, window_bounds = array<i64: 9, 4, 128>}, {transform_indices = @transform_2, window_bounds = array<i64: 1, 128>}, {transform_indices = @transform_3, window_bounds = array<i64: 1, 288, 128>}]} {
    %c0 = arith.constant 0 : index
    %c0_0 = arith.constant 0 : index
    %c0_1 = arith.constant 0 : index
    %0 = vector.load %arg2[%c0, %c0_0, %c0_1] : memref<1x342x4xbf16, #tpu.memory_space<vmem>>, vector<1x288x4xbf16>
    %1 = vector.shape_cast %0 : vector<1x288x4xbf16> to vector<288x4xbf16>
    %c0_2 = arith.constant 0 : index
    %c0_3 = arith.constant 0 : index
    %c0_4 = arith.constant 0 : index
    %2 = vector.load %arg3[%c0_2, %c0_3, %c0_4] : memref<9x4x128xbf16, #tpu.memory_space<vmem>>, vector<1x4x128xbf16>
    %3 = vector.shape_cast %2 : vector<1x4x128xbf16> to vector<4x128xbf16>
    %cst = arith.constant dense<0.000000e+00> : vector<288x128xf32>
    %4 = tpu.matmul %1, %3, %cst {dimension_numbers = #tpu.dot_dimension_numbers<[1], [0], [0], [1], [0, 0, 1, 1], [], []>} : vector<288x4xbf16>, vector<4x128xbf16>, vector<288x128xf32> -> vector<288x128xf32>
    %c0_5 = arith.constant 0 : index
    %c1 = arith.constant 1 : index
    %c0_6 = arith.constant 0 : index
    %5 = vector.load %arg2[%c0_5, %c1, %c0_6] : memref<1x342x4xbf16, #tpu.memory_space<vmem>>, vector<1x288x4xbf16>
    %6 = vector.shape_cast %5 : vector<1x288x4xbf16> to vector<288x4xbf16>
    %c1_7 = arith.constant 1 : index
    %c0_8 = arith.constant 0 : index
    %c0_9 = arith.constant 0 : index
    %7 = vector.load %arg3[%c1_7, %c0_8, %c0_9] : memref<9x4x128xbf16, #tpu.memory_space<vmem>>, vector<1x4x128xbf16>
    %8 = vector.shape_cast %7 : vector<1x4x128xbf16> to vector<4x128xbf16>
    %cst_10 = arith.constant dense<0.000000e+00> : vector<288x128xf32>
    %9 = tpu.matmul %6, %8, %cst_10 {dimension_numbers = #tpu.dot_dimension_numbers<[1], [0], [0], [1], [0, 0, 1, 1], [], []>} : vector<288x4xbf16>, vector<4x128xbf16>, vector<288x128xf32> -> vector<288x128xf32>
    %10 = arith.addf %4, %9 : vector<288x128xf32>
    %c0_11 = arith.constant 0 : index
    %c2 = arith.constant 2 : index
    %c0_12 = arith.constant 0 : index
    %11 = vector.load %arg2[%c0_11, %c2, %c0_12] : memref<1x342x4xbf16, #tpu.memory_space<vmem>>, vector<1x288x4xbf16>
    %12 = vector.shape_cast %11 : vector<1x288x4xbf16> to vector<288x4xbf16>
    %c2_13 = arith.constant 2 : index
    %c0_14 = arith.constant 0 : index
    %c0_15 = arith.constant 0 : index
    %13 = vector.load %arg3[%c2_13, %c0_14, %c0_15] : memref<9x4x128xbf16, #tpu.memory_space<vmem>>, vector<1x4x128xbf16>
    %14 = vector.shape_cast %13 : vector<1x4x128xbf16> to vector<4x128xbf16>
    %cst_16 = arith.constant dense<0.000000e+00> : vector<288x128xf32>
    %15 = tpu.matmul %12, %14, %cst_16 {dimension_numbers = #tpu.dot_dimension_numbers<[1], [0], [0], [1], [0, 0, 1, 1], [], []>} : vector<288x4xbf16>, vector<4x128xbf16>, vector<288x128xf32> -> vector<288x128xf32>
    %16 = arith.addf %10, %15 : vector<288x128xf32>
    %c0_17 = arith.constant 0 : index
    %c18 = arith.constant 18 : index
    %c0_18 = arith.constant 0 : index
    %17 = vector.load %arg2[%c0_17, %c18, %c0_18] : memref<1x342x4xbf16, #tpu.memory_space<vmem>>, vector<1x288x4xbf16>
    %18 = vector.shape_cast %17 : vector<1x288x4xbf16> to vector<288x4xbf16>
    %c3 = arith.constant 3 : index
    %c0_19 = arith.constant 0 : index
    %c0_20 = arith.constant 0 : index
    %19 = vector.load %arg3[%c3, %c0_19, %c0_20] : memref<9x4x128xbf16, #tpu.memory_space<vmem>>, vector<1x4x128xbf16>
    %20 = vector.shape_cast %19 : vector<1x4x128xbf16> to vector<4x128xbf16>
    %cst_21 = arith.constant dense<0.000000e+00> : vector<288x128xf32>
    %21 = tpu.matmul %18, %20, %cst_21 {dimension_numbers = #tpu.dot_dimension_numbers<[1], [0], [0], [1], [0, 0, 1, 1], [], []>} : vector<288x4xbf16>, vector<4x128xbf16>, vector<288x128xf32> -> vector<288x128xf32>
    %22 = arith.addf %16, %21 : vector<288x128xf32>
    %c0_22 = arith.constant 0 : index
    %c19 = arith.constant 19 : index
    %c0_23 = arith.constant 0 : index
    %23 = vector.load %arg2[%c0_22, %c19, %c0_23] : memref<1x342x4xbf16, #tpu.memory_space<vmem>>, vector<1x288x4xbf16>
    %24 = vector.shape_cast %23 : vector<1x288x4xbf16> to vector<288x4xbf16>
    %c4 = arith.constant 4 : index
    %c0_24 = arith.constant 0 : index
    %c0_25 = arith.constant 0 : index
    %25 = vector.load %arg3[%c4, %c0_24, %c0_25] : memref<9x4x128xbf16, #tpu.memory_space<vmem>>, vector<1x4x128xbf16>
    %26 = vector.shape_cast %25 : vector<1x4x128xbf16> to vector<4x128xbf16>
    %cst_26 = arith.constant dense<0.000000e+00> : vector<288x128xf32>
    %27 = tpu.matmul %24, %26, %cst_26 {dimension_numbers = #tpu.dot_dimension_numbers<[1], [0], [0], [1], [0, 0, 1, 1], [], []>} : vector<288x4xbf16>, vector<4x128xbf16>, vector<288x128xf32> -> vector<288x128xf32>
    %28 = arith.addf %22, %27 : vector<288x128xf32>
    %c0_27 = arith.constant 0 : index
    %c20 = arith.constant 20 : index
    %c0_28 = arith.constant 0 : index
    %29 = vector.load %arg2[%c0_27, %c20, %c0_28] : memref<1x342x4xbf16, #tpu.memory_space<vmem>>, vector<1x288x4xbf16>
    %30 = vector.shape_cast %29 : vector<1x288x4xbf16> to vector<288x4xbf16>
    %c5 = arith.constant 5 : index
    %c0_29 = arith.constant 0 : index
    %c0_30 = arith.constant 0 : index
    %31 = vector.load %arg3[%c5, %c0_29, %c0_30] : memref<9x4x128xbf16, #tpu.memory_space<vmem>>, vector<1x4x128xbf16>
    %32 = vector.shape_cast %31 : vector<1x4x128xbf16> to vector<4x128xbf16>
    %cst_31 = arith.constant dense<0.000000e+00> : vector<288x128xf32>
    %33 = tpu.matmul %30, %32, %cst_31 {dimension_numbers = #tpu.dot_dimension_numbers<[1], [0], [0], [1], [0, 0, 1, 1], [], []>} : vector<288x4xbf16>, vector<4x128xbf16>, vector<288x128xf32> -> vector<288x128xf32>
    %34 = arith.addf %28, %33 : vector<288x128xf32>
    %c0_32 = arith.constant 0 : index
    %c36 = arith.constant 36 : index
    %c0_33 = arith.constant 0 : index
    %35 = vector.load %arg2[%c0_32, %c36, %c0_33] : memref<1x342x4xbf16, #tpu.memory_space<vmem>>, vector<1x288x4xbf16>
    %36 = vector.shape_cast %35 : vector<1x288x4xbf16> to vector<288x4xbf16>
    %c6 = arith.constant 6 : index
    %c0_34 = arith.constant 0 : index
    %c0_35 = arith.constant 0 : index
    %37 = vector.load %arg3[%c6, %c0_34, %c0_35] : memref<9x4x128xbf16, #tpu.memory_space<vmem>>, vector<1x4x128xbf16>
    %38 = vector.shape_cast %37 : vector<1x4x128xbf16> to vector<4x128xbf16>
    %cst_36 = arith.constant dense<0.000000e+00> : vector<288x128xf32>
    %39 = tpu.matmul %36, %38, %cst_36 {dimension_numbers = #tpu.dot_dimension_numbers<[1], [0], [0], [1], [0, 0, 1, 1], [], []>} : vector<288x4xbf16>, vector<4x128xbf16>, vector<288x128xf32> -> vector<288x128xf32>
    %40 = arith.addf %34, %39 : vector<288x128xf32>
    %c0_37 = arith.constant 0 : index
    %c37 = arith.constant 37 : index
    %c0_38 = arith.constant 0 : index
    %41 = vector.load %arg2[%c0_37, %c37, %c0_38] : memref<1x342x4xbf16, #tpu.memory_space<vmem>>, vector<1x288x4xbf16>
    %42 = vector.shape_cast %41 : vector<1x288x4xbf16> to vector<288x4xbf16>
    %c7 = arith.constant 7 : index
    %c0_39 = arith.constant 0 : index
    %c0_40 = arith.constant 0 : index
    %43 = vector.load %arg3[%c7, %c0_39, %c0_40] : memref<9x4x128xbf16, #tpu.memory_space<vmem>>, vector<1x4x128xbf16>
    %44 = vector.shape_cast %43 : vector<1x4x128xbf16> to vector<4x128xbf16>
    %cst_41 = arith.constant dense<0.000000e+00> : vector<288x128xf32>
    %45 = tpu.matmul %42, %44, %cst_41 {dimension_numbers = #tpu.dot_dimension_numbers<[1], [0], [0], [1], [0, 0, 1, 1], [], []>} : vector<288x4xbf16>, vector<4x128xbf16>, vector<288x128xf32> -> vector<288x128xf32>
    %46 = arith.addf %40, %45 : vector<288x128xf32>
    %c0_42 = arith.constant 0 : index
    %c38 = arith.constant 38 : index
    %c0_43 = arith.constant 0 : index
    %47 = vector.load %arg2[%c0_42, %c38, %c0_43] : memref<1x342x4xbf16, #tpu.memory_space<vmem>>, vector<1x288x4xbf16>
    %48 = vector.shape_cast %47 : vector<1x288x4xbf16> to vector<288x4xbf16>
    %c8 = arith.constant 8 : index
    %c0_44 = arith.constant 0 : index
    %c0_45 = arith.constant 0 : index
    %49 = vector.load %arg3[%c8, %c0_44, %c0_45] : memref<9x4x128xbf16, #tpu.memory_space<vmem>>, vector<1x4x128xbf16>
    %50 = vector.shape_cast %49 : vector<1x4x128xbf16> to vector<4x128xbf16>
    %cst_46 = arith.constant dense<0.000000e+00> : vector<288x128xf32>
    %51 = tpu.matmul %48, %50, %cst_46 {dimension_numbers = #tpu.dot_dimension_numbers<[1], [0], [0], [1], [0, 0, 1, 1], [], []>} : vector<288x4xbf16>, vector<4x128xbf16>, vector<288x128xf32> -> vector<288x128xf32>
    %52 = arith.addf %46, %51 : vector<288x128xf32>
    %c0_47 = arith.constant 0 : index
    %c0_48 = arith.constant 0 : index
    %53 = vector.load %arg4[%c0_47, %c0_48] : memref<1x128xf32, #tpu.memory_space<vmem>>, vector<1x128xf32>
    %54 = vector.broadcast %53 : vector<1x128xf32> to vector<288x128xf32>
    %55 = arith.addf %52, %54 : vector<288x128xf32>
    %cst_49 = arith.constant 0.000000e+00 : f32
    %56 = vector.broadcast %cst_49 : f32 to vector<288x128xf32>
    %57 = arith.maximumf %55, %56 : vector<288x128xf32>
    %cst_50 = arith.constant 6.000000e+00 : f32
    %58 = vector.broadcast %cst_50 : f32 to vector<288x128xf32>
    %59 = arith.minimumf %57, %58 : vector<288x128xf32>
    %c0_51 = arith.constant 0 : index
    %c0_52 = arith.constant 0 : index
    %c0_53 = arith.constant 0 : index
    %60 = vector.load %arg5[%c0_51, %c0_52, %c0_53] : memref<1x288x128xf32, #tpu.memory_space<vmem>>, vector<1x288x128xf32>
    %61 = vector.shape_cast %60 : vector<1x288x128xf32> to vector<288x128xf32>
    %62 = vector.shape_cast %59 : vector<288x128xf32> to vector<1x288x128xf32>
    tpu.vector_store %arg5[%c0_51, %c0_52, %c0_53], %62 {strides = array<i32>} : memref<1x288x128xf32, #tpu.memory_space<vmem>>, vector<1x288x128xf32>,
    return
  }
  func.func @transform_0(%arg0: i32, %arg1: i32) -> (i32, i32, i32) {
    %c0_i32 = arith.constant 0 : i32
    %c0_i32_0 = arith.constant 0 : i32
    %c0_i32_1 = arith.constant 0 : i32
    return %arg0, %c0_i32, %c0_i32_0 : i32, i32, i32
  }
  func.func @transform_1(%arg0: i32, %arg1: i32) -> (i32, i32, i32) {
    %c0_i32 = arith.constant 0 : i32
    %c0_i32_0 = arith.constant 0 : i32
    %c0_i32_1 = arith.constant 0 : i32
    return %c0_i32, %c0_i32_0, %arg1 : i32, i32, i32
  }
  func.func @transform_2(%arg0: i32, %arg1: i32) -> (i32, i32) {
    %c0_i32 = arith.constant 0 : i32
    %c0_i32_0 = arith.constant 0 : i32
    return %c0_i32, %arg1 : i32, i32
  }
  func.func @transform_3(%arg0: i32, %arg1: i32) -> (i32, i32, i32) {
    %c0_i32 = arith.constant 0 : i32
    %c0_i32_0 = arith.constant 0 : i32
    return %arg0, %c0_i32, %arg1 : i32, i32, i32
  }
}

</mosaic_0001>

<bundles_post_ra>
// kernel: tpu_custom_call.1
= control target key start
LH: loop header
LB: loop body
LE: loop exit
PB: predicated region body
PF: predicated region fallthrough
CT: control target
= control target key end

     0   :  { %8 = vsyncpa [#allocation3], 0  ;;  %s6253_s0 = inlined_call_operand.vmem [shape: bf16[2,342,4], index: 0, kind: input, shape index: {}]   ;;  %s6254_s1 = inlined_call_operand.vmem [shape: bf16[9,4,128], index: 1, kind: input, shape index: {}]   ;;  %s6255_s2 = inlined_call_operand.vmem [shape: f32[1,128], index: 2, kind: input, shape index: {}]   ;;  %s6256_s3 = inlined_call_operand.hbm [shape: f32[2,288,128], index: 3, kind: output, shape index: {}]  }
   0x1   :  { %10 = vsyncpa [#allocation3 + $0x1], 0  ;;  %s5221_s12 = smov 0   ;;  %s5223_s13 = smov 0  }
   0x2   :  { %s5225_s14 = smov 0   ;;  %s5227_s15 = smov 0  }
   0x3   :  { %s5229_s16 = smov 0   ;;  %s5231_s17 = smov 0  }
   0x4 LB: > { %s3928_s18 = sadd.s32 4294967295, %s5196_s17   ;;  %s3929_s19 = sadd.s32 4294967294, %s5196_s17   ;;  %s5196_s17 = sphi %s5231_s17, %s16_s17   ;;  %s5192_s16 = sphi %s5229_s16, %s6263_s16   ;;  %s5188_s15 = sphi %s5227_s15, %s6262_s15   ;;  %s5184_s14 = sphi %s5225_s14, %s6261_s14   ;;  %s5180_s13 = sphi %s5223_s13, %s6260_s13   ;;  %s5176_s12 = sphi %s5221_s12, %s6259_s12  }
   0x5   : > { %s28_s20 = sadd.s32 1, %s5192_s16  ;;  %s115_s21 = sadd.s32 1, %s5184_s14 }
   0x6   : > { %p30_p0 = scmp.ge.s32.totalorder %s28_s20, 2  ;;  %p125_p1 = scmp.ne.s32.totalorder %s5184_s14, %s5180_s13 }
   0x7   : > { %p126_p2 = scmp.eq.s32.totalorder %s3928_s18, 1  ;;  %p131_p3 = scmp.ne.s32.totalorder %s5180_s13, %s5176_s12 }
   0x8   : > { %s6265_s20 = smov (%p30_p0, %s28_s20), 0  ;;  %p132_p5 = scmp.eq.s32.totalorder %s3929_s19, 1 }
   0x9   : > { %p5261_p4 = por %p126_p2, %p125_p1  ;;  %s110_s23 = ssub.s32 %s5192_s16, %s6265_s20 }
   0xa   : > { %p3934_p6 = scmp.ge.s32.totalorder %s5196_s17, 1  ;;  %p113_p7 = scmp.eq.s32.totalorder %s110_s23, 0 }
   0xb   : > { %p5268_p8 = por %p132_p5, %p131_p3  ;;  %p171_p9 = scmp.lt.s32.totalorder %s5196_s17, 3 }
   0xc   : > { %s5274_s25 = scalar_select %p113_p7, %s5184_s14, %s115_s21  }
   0xd   : > { %p172_p10 = pnand %p3934_p6, %p171_p9 }
   0xe   : > { %vm552_vm0 = vcmask (!%p172_p10), 1041408   ;;  %v4050_v0 = vld [vmem:[%s6254_s1 + $0x8] sm:$0x3] (!%p172_p10)  ;;  %v3936_v1 = vld [vmem:[%s6254_s1 + $0x2] sm:$0x3] (!%p172_p10)  ;;  %p202_p11 = scmp.lt.s32.totalorder (!%p172_p10), %s5188_s15, 1 }
   0xf   : > { %175 = sbr.rel (%p172_p10) target bundleno = 599 (0x257), region = 32  ;;  %4979 = vmatprep.subr.msk.bf16.mxu0 (!%p172_p10), %vm552_vm0, %v4050_v0  ;;  %4975 = vmatprep.subr.msk.bf16.mxu1 (!%p172_p10), %vm552_vm0, %v3936_v1  ;;  %v5286_v2 = vsel (!%p172_p10), %vm552_vm0, %v4050_v0, 0  ;;  %v554_v3 = vsel (!%p172_p10), %vm552_vm0, %v3936_v1, 0  ;;  %v4070_v4 = vld [vmem:[%s6254_s1 + $0xa] sm:$0x3] (!%p172_p10)  ;;  %vm497_vm2 = vcmask (!%p172_p10), 31744  }
  0x10   : > { %4496 = vmatpush3.bf16.msra.mxu0 (!%p172_p10), %v5286_v2  ;;  %4344 = vmatpush3.bf16.msra.mxu1 (!%p172_p10), %v554_v3  ;;  %v251_v5 = vld [vmem:[%s6254_s1] sm:$0x3] (!%p172_p10)  ;;  %vm348_vm1 = vsmask.f32 (!%p172_p10), 7424  ;;  %v5305_v6 = vsel (!%p172_p10), %vm552_vm0, %v4070_v4, 0  ;;  %vm2155_vm4 = vcmask (!%p172_p10), 1045504  }
  0x11   : > { %4981 = vmatprep.subr.msk.bf16.mxu0 (!%p172_p10), %vm552_vm0, %v4070_v4  ;;  %4976 = vmatprep.subr.msk.bf16.mxu1 (!%p172_p10), %vm552_vm0, %v251_v5  ;;  %vm1708_vm3 = vsmask.f32 (!%p172_p10), 6400  ;;  %v770_v12 = vsel (!%p172_p10), %vm552_vm0, %v251_v5, 0  ;;  %v5353_v39 = vld [vmem:[%s6254_s1 + $0x4] sm:$0x3] (!%p172_p10)  ;;  %vm955_vm5 = vcmask (!%p172_p10), 1046528  }
  0x12   : > { %v5387_v1 = vld [vmem:[%s6254_s1 + $0xc] sm:$0x3] (!%p172_p10)  ;;  %vm2908_vm6 = vsmask.f32 (!%p172_p10), 5376  ;;  %vm3355_vm7 = vcmask (!%p172_p10), 1044480   ;;  %s199_s7 = sand.u32 (!%p172_p10), 1, %s5180_s13  }
  0x13   : > { %s4985_s10 = smul.u32 (!%p172_p10), 288, %s199_s7  ;;  %s5198_s28 = smov (!%p172_p10), [#allocation2]  }
  0x14   : > { %s4987_s18 = smul.u32 (!%p172_p10), 4608, %s5188_s15  ;;  %s5122_s29 = sshll.u32 (!%p172_p10), %s5198_s28, 4  ;;  %s5123_s29 = int_to_ptr.vmem [resolvable:$false] %s5122_s29 }
  0x16   : > { %s203_s30 = scalar_select %p202_p11, %s5188_s15, 1 }
  0x17   : > { %s6198_s26 = scalar_lea.hbm %s6256_s3, %s4987_s18  ;;  %s6207_s15 = scalar_lea.sflag [#allocation3], %s199_s7 }
  0x18   : > { %s4986_s8 = smul.u32 172, %s203_s30  ;;  %s5124_s30 = scalar_lea.vmem %s5123_s29, 9216 }
  0x1a   : > { %s5302_s11 = scalar_lea.vmem %s6253_s0, %s4986_s8 }
  0x1b   : > { %v215_v7 = vld [vmem:[%s5302_s11] sm:$0xf]  ;;  %v5309_v8 = vld [vmem:[%s5302_s11 + $0x4] sm:$0xf]  ;;  %v5315_v10 = vld [vmem:[%s5302_s11 + $0x8] sm:$0xff]  }
  0x1c   : > { %v5312_v9 = vcombine.low %v215_v7, %v5309_v8  ;;  %v1263_v11 = vld [vmem:[%s5302_s11 + $0x8] sm:$0xe]  ;;  %v5320_v13 = vld [vmem:[%s5302_s11 + $0xc] sm:$0xf]  ;;  %v357_v16 = vshll.u32 %v5315_v10, 16  ;;  %v361_v17 = vshrl.u32 %v5315_v10, 16 }
  0x1d   : > { %v5327_v18 = vld [vmem:[%s5302_s11 + $0x10] sm:$0xff]   ;;  %v5333_v20 = vcombine.low %v1263_v11, %v5320_v13  ;;  %v5341_v28 = vld [vmem:[%s5302_s11 + $0x18] sm:$0xff]   ;;  %v5347_v34 = vld [vmem:[%s5302_s11 + $0x20] sm:$0xff]  }
  0x1e   : > { %v350_v14 = vshrl.u32 %v5312_v9, 16  ;;  %v352_v15 = vshll.u32 %v5312_v9, 16  ;;  %v5330_v19 = vld [vmem:[%s5302_s11 + $0x10] sm:$0xff]   ;;  %v359_v22 = vrot.slane %v357_v16, 1  ;;  %v1718_v23 = vshrl.u32 %v5327_v18, 16  ;;  %v5344_v33 = vld [vmem:[%s5302_s11 + $0x18] sm:$0xff]  }
  0x1f   : > { %v1721_v24 = vshll.u32 %v5327_v18, 16  ;;  %v1710_v25 = vshrl.u32 %v5333_v20, 16  ;;  %v1713_v26 = vshll.u32 %v5333_v20, 16  ;;  %v365_v27 = vshll.u32 %v5330_v19, 16  ;;  %v5362_v48 = vld [vmem:[%s5302_s11 + $0x20] sm:$0xff]   ;;  %v5365_v49 = vld [vmem:[%s5302_s11 + $0x28] sm:$0xff]  }
  0x20   : > { %v354_v21 = vrot.slane %v352_v15, 1  ;;  %v363_v30 = vor.u32 %v361_v17, %v359_v22  ;;  %v1720_v31 = vrot.slane %v1718_v23, 1  ;;  %v1727_v38 = vshrl.u32 %v5341_v28, 16  ;;  %v5371_v54 = vld [vmem:[%s5302_s11 + $0x28] sm:$0xff]   ;;  %v5377_v59 = vld [vmem:[%s5302_s11 + $0x30] sm:$0xff]   ;;  %v5401_v23 = vld [vmem:[%s5302_s11 + $0x38] sm:$0xff]  }
  0x21   : > { %v1723_v32 = vrot.slane %v1721_v24, 2  ;;  %v1712_v35 = vrot.slane %v1710_v25, 1  ;;  %v1715_v36 = vrot.slane %v1713_v26, 2  ;;  %v367_v37 = vrot.slane %v365_v27, 1  ;;  %v5382_v0 = vld [vmem:[%s5302_s11 + $0x30] sm:$0xff]  }
  0x22   : > { %v355_v29 = vor.u32 %v354_v21, %v350_v14  ;;  %v1730_v42 = vshll.u32 %v5341_v28, 16  ;;  %v369_v43 = vshrl.u32 %v5330_v19, 16  ;;  %v1729_v46 = vrot.slane %v1727_v38, 1 }
  0x23   : > { %v1724_v41 = vor.u32 %v1723_v32, %v1720_v31  ;;  %v1716_v44 = vor.u32 %v1715_v36, %v1712_v35  ;;  %v368_v45 = vsel %vm348_vm1, %v363_v30, %v367_v37  ;;  %v373_v47 = vshll.u32 %v5344_v33, 16  ;;  %v5410_v35 = vld [vmem:[%s5302_s11 + $0x38] sm:$0xff]  }
  0x24   : > { %v360_v40 = vsel %vm348_vm1, %v355_v29, %v359_v22  ;;  %v1732_v50 = vrot.slane %v1730_v42, 2  ;;  %v371_v51 = vor.u32 %v369_v43, %v367_v37  ;;  %v1736_v52 = vshrl.u32 %v5347_v34, 16 }
  0x25   : > { %4345 = vmatprep.mubr.msk.bf16.mxu1 %vm497_vm2, %v360_v40  ;;  %v1739_v53 = vshll.u32 %v5347_v34, 16  ;;  %v1725_v55 = vsel %vm1708_vm3, %v1716_v44, %v1724_v41  ;;  %v375_v56 = vrot.slane %v373_v47, 1  ;;  %v377_v57 = vshrl.u32 %v5344_v33, 16  ;;  %v5421_v44 = vld [vmem:[%s5302_s11 + $0x40] sm:$0xff]  }
  0x26   : > { %4346 = vmatmul.mubr.msk.bf16.vlgmr.msra.gmra.mrb[0].mxu1 %vm497_vm2, %v368_v45  ;;  %v381_v58 = vshll.u32 %v5362_v48, 16  ;;  %4497 = vmatprep.mubr.msk.bf16.mxu0 %vm497_vm2, %v1725_v55  ;;  %v1733_v60 = vor.u32 %v1732_v50, %v1729_v46  ;;  %v1738_v61 = vrot.slane %v1736_v52, 1  ;;  %v1745_v63 = vshrl.u32 %v5365_v49, 16 }
  0x27   : > { %4382 = vmatpush3.bf16.msra.mxu1 %v770_v12  ;;  %v1741_v62 = vrot.slane %v1739_v53, 2  ;;  %v376_v3 = vsel %vm348_vm1, %v371_v51, %v375_v56  ;;  %v379_v4 = vor.u32 %v377_v57, %v375_v56  ;;  %v1748_v7 = vshll.u32 %v5365_v49, 16  ;;  %v5426_v51 = vld [vmem:[%s5302_s11 + $0x40] sm:$0xff]  }
  0x28   : > { %4977 = vmatprep.subr.msk.bf16.mxu1 %vm552_vm0, %v5353_v39  ;;  %v383_v5 = vrot.slane %v381_v58, 1  ;;  %v1734_v11 = vsel %vm1708_vm3, %v1724_v41, %v1733_v60  ;;  %4349 = vmatprep.mubr.msk.bf16.mxu1 %vm497_vm2, %v376_v3  ;;  %v1747_v14 = vrot.slane %v1745_v63, 1  ;;  %v385_v15 = vshrl.u32 %v5362_v48, 16  ;;  %v5437_v63 = vld [vmem:[%s5302_s11 + $0x48] sm:$0xff]  }
  0x29   : > { %v1742_v12 = vor.u32 %v1741_v62, %v1738_v61  ;;  %4498 = vmatmul.mubr.msk.bf16.vlgmr.msra.gmra.mrb[0].mxu0 %vm497_vm2, %v1734_v11  ;;  %v1750_v17 = vrot.slane %v1748_v7, 2  ;;  %v389_v21 = vshll.u32 %v5371_v54, 16  ;;  %v1754_v22 = vshrl.u32 %v5377_v59, 16  ;;  %v5434_v62 = vld [vmem:[%s5302_s11 + $0x48] sm:$0xff]  }
  0x2a   : > { %v384_v16 = vsel %vm348_vm1, %v379_v4, %v383_v5  ;;  %4534 = vmatpush3.bf16.msra.mxu0 %v5305_v6  ;;  %v387_v25 = vor.u32 %v385_v15, %v383_v5  ;;  %v1757_v26 = vshll.u32 %v5377_v59, 16  ;;  %v393_v27 = vshrl.u32 %v5371_v54, 16 }
  0x2b   : > { %v1743_v24 = vsel %vm1708_vm3, %v1733_v60, %v1742_v12  ;;  %v1751_v29 = vor.u32 %v1750_v17, %v1747_v14  ;;  %v391_v30 = vrot.slane %v389_v21, 1  ;;  %v1756_v31 = vrot.slane %v1754_v22, 1  ;;  %4982 = vmatprep.subr.msk.bf16.mxu0 %vm552_vm0, %v5387_v1  ;;  %v5446_v14 = vld [vmem:[%s5302_s11 + $0x50] sm:$0xff]  }
  0x2c   : > { %4501 = vmatprep.mubr.msk.bf16.mxu0 %vm497_vm2, %v1743_v24  ;;  %v397_v32 = vshll.u32 %v5382_v0, 16  ;;  %v1759_v6 = vrot.slane %v1757_v26, 2  ;;  %v1763_v36 = vshrl.u32 %v5401_v23, 16  ;;  %v1766_v37 = vshll.u32 %v5401_v23, 16 }
  0x2d   : > { %v401_v38 = vshrl.u32 %v5382_v0, 16  ;;  %v1752_v40 = vsel %vm1708_vm3, %v1742_v12, %v1751_v29  ;;  %v392_v41 = vsel %vm348_vm1, %v387_v25, %v391_v30  ;;  %v395_v42 = vor.u32 %v393_v27, %v391_v30  ;;  %v5454_v25 = vld [vmem:[%s5302_s11 + $0x50] sm:$0xff]  }
  0x2e   : > { %4350 = vmatmul.mubr.msk.bf16.gmra.mrb[4].mxu1 %vm497_vm2, %v384_v16  ;;  %v399_v43 = vrot.slane %v397_v32, 1  ;;  %v1760_v45 = vor.u32 %v1759_v6, %v1756_v31  ;;  %v1765_v46 = vrot.slane %v1763_v36, 1  ;;  %v1768_v47 = vrot.slane %v1766_v37, 2 }
  0x2f   : > { %4353 = vmatprep.mubr.msk.bf16.mxu1 %vm497_vm2, %v392_v41  ;;  %v405_v50 = vshll.u32 %v5410_v35, 16  ;;  %v1772_v55 = vshrl.u32 %v5421_v44, 16  ;;  %v1775_v56 = vshll.u32 %v5421_v44, 16  ;;  %v409_v61 = vshrl.u32 %v5410_v35, 16  ;;  %v5464_v41 = vld [vmem:[%s5302_s11 + $0x58] sm:$0xff]  }
  0x30   : > { %v400_v52 = vsel %vm348_vm1, %v395_v42, %v399_v43  ;;  %v403_v53 = vor.u32 %v401_v38, %v399_v43  ;;  %v1761_v57 = vsel %vm1708_vm3, %v1751_v29, %v1760_v45  ;;  %v1769_v58 = vor.u32 %v1768_v47, %v1765_v46  ;;  %v5459_v29 = vld [vmem:[%s5302_s11 + $0x58] sm:$0xff]  }
  0x31   : > { %v407_v60 = vrot.slane %v405_v50, 1  ;;  %4502 = vmatmul.mubr.msk.bf16.gmra.mrb[4].mxu0 %vm497_vm2, %v1752_v40  ;;  %v1774_v3 = vrot.slane %v1772_v55, 1  ;;  %v1777_v4 = vrot.slane %v1775_v56, 2  ;;  %v413_v5 = vshll.u32 %v5426_v51, 16 }
  0x32   : > { %v417_v7 = vshrl.u32 %v5426_v51, 16  ;;  %4505 = vmatprep.mubr.msk.bf16.mxu0 %vm497_vm2, %v1761_v57  ;;  %v1781_v12 = vshrl.u32 %v5434_v62, 16  ;;  %v1784_v16 = vshll.u32 %v5434_v62, 16  ;;  %v421_v17 = vshll.u32 %v5437_v63, 16  ;;  %v2149_v57 = vld [vmem:[%s5302_s11 + $0x8] sm:$0xc] }
  0x33   : > { %v408_v11 = vsel %vm348_vm1, %v403_v53, %v407_v60  ;;  %v1778_v15 = vor.u32 %v1777_v4, %v1774_v3  ;;  %v415_v21 = vrot.slane %v413_v5, 1  ;;  %v1790_v22 = vshrl.u32 %v5446_v14, 16 }
  0x34   : > { %v1793_v24 = vshll.u32 %v5446_v14, 16  ;;  %v1770_v26 = vsel %vm1708_vm3, %v1760_v45, %v1769_v58  ;;  %v411_v27 = vor.u32 %v409_v61, %v407_v60  ;;  %v1783_v30 = vrot.slane %v1781_v12, 1 }
  0x35   : > { %v1786_v31 = vrot.slane %v1784_v16, 2  ;;  %v419_v32 = vor.u32 %v417_v7, %v415_v21  ;;  %v423_v6 = vrot.slane %v421_v17, 1  ;;  %v1779_v36 = vsel %vm1708_vm3, %v1769_v58, %v1778_v15  ;;  %v5478_v58 = vld [vmem:[%s5302_s11 + $0x60] sm:$0xff]  }
  0x36   : > { %4354 = vmatmul.mubr.msk.bf16.gmra.mrb[8].mxu1 %vm497_vm2, %v400_v52  ;;  %v1792_v37 = vrot.slane %v1790_v22, 1  ;;  %v1795_v38 = vrot.slane %v1793_v24, 2  ;;  %v429_v40 = vshll.u32 %v5454_v25, 16  ;;  %v416_v42 = vsel %vm348_vm1, %v411_v27, %v415_v21 }
  0x37   : > { %4357 = vmatprep.mubr.msk.bf16.mxu1 %vm497_vm2, %v408_v11  ;;  %v425_v43 = vshrl.u32 %v5437_v63, 16  ;;  %v1799_v45 = vshrl.u32 %v5459_v29, 16  ;;  %v1802_v46 = vshll.u32 %v5459_v29, 16  ;;  %v1787_v47 = vor.u32 %v1786_v31, %v1783_v30  ;;  %v5483_v11 = vld [vmem:[%s5302_s11 + $0x68] sm:$0xff]  }
  0x38   : > { %v424_v50 = vsel %vm348_vm1, %v419_v32, %v423_v6  ;;  %v433_v52 = vshrl.u32 %v5454_v25, 16  ;;  %v437_v53 = vshll.u32 %v5464_v41, 16  ;;  %v1796_v55 = vor.u32 %v1795_v38, %v1792_v37  ;;  %v5500_v32 = vld [vmem:[%s5302_s11 + $0x70] sm:$0xff]  }
  0x39   : > { %4506 = vmatmul.mubr.msk.bf16.gmra.mrb[8].mxu0 %vm497_vm2, %v1770_v26  ;;  %v431_v56 = vrot.slane %v429_v40, 1  ;;  %v427_v60 = vor.u32 %v425_v43, %v423_v6  ;;  %v1801_v61 = vrot.slane %v1799_v45, 1  ;;  %v1804_v3 = vrot.slane %v1802_v46, 2  ;;  %v5506_v40 = vld [vmem:[%s5302_s11 + $0x78] sm:$0xff]  }
  0x3a   : > { %4509 = vmatprep.mubr.msk.bf16.mxu0 %vm497_vm2, %v1779_v36  ;;  %v1788_v4 = vsel %vm1708_vm3, %v1778_v15, %v1787_v47  ;;  %v439_v7 = vrot.slane %v437_v53, 1  ;;  %v1797_v12 = vsel %vm1708_vm3, %v1787_v47, %v1796_v55  ;;  %v4071_v16 = vcombine.low %v2149_v57, %v5320_v13 }
  0x3b   : > { %v435_v5 = vor.u32 %v433_v52, %v431_v56  ;;  %v445_v17 = vshll.u32 %v5478_v58, 16  ;;  %v432_v21 = vsel %vm348_vm1, %v427_v60, %v431_v56  ;;  %v441_v22 = vshrl.u32 %v5464_v41, 16  ;;  %v5521_v56 = vld [vmem:[%s5302_s11 + $0x80] sm:$0xff]  }
  0x3c   : > { %v5492_v15 = vor.u32 %v1804_v3, %v1801_v61  ;;  %v449_v26 = vshrl.u32 %v5478_v58, 16  ;;  %v453_v27 = vshll.u32 %v5483_v11, 16  ;;  %v2156_v13 = vrot.slane %v4071_v16, 2 }
  0x3d   : > { %v440_v24 = vsel %vm348_vm1, %v435_v5, %v439_v7  ;;  %v2157_v30 = vrot.slane %v5327_v18, 2  ;;  %v447_v31 = vrot.slane %v445_v17, 1  ;;  %v443_v6 = vor.u32 %v441_v22, %v439_v7 }
  0x3e   : > { %4358 = vmatmul.mubr.msk.bf16.gmra.mrb[12].mxu1 %vm497_vm2, %v416_v42  ;;  %v1806_v36 = vsel %vm1708_vm3, %v1796_v55, %v5492_v15  ;;  %v455_v38 = vrot.slane %v453_v27, 1  ;;  %v461_v18 = vshll.u32 %v5500_v32, 16  ;;  %v2159_v45 = vrot.slane %v5341_v28, 2  ;;  %v5551_v27 = vld [vmem:[%s5302_s11 + $0x90] ss:$0 sps:$4 sm:$0x11]  }
  0x3f   : > { %4361 = vmatprep.mubr.msk.bf16.mxu1 %vm497_vm2, %v424_v50  ;;  %v451_v37 = vor.u32 %v449_v26, %v447_v31  ;;  %v2158_v42 = vsel %vm2155_vm4, %v2156_v13, %v2157_v30  ;;  %v448_v43 = vsel %vm348_vm1, %v443_v6, %v447_v31  ;;  %v457_v46 = vshrl.u32 %v5483_v11, 16 }
  0x40   : > { %v465_v50 = vshrl.u32 %v5500_v32, 16  ;;  %v469_v52 = vshll.u32 %v5506_v40, 16  ;;  %v2161_v53 = vrot.slane %v5347_v34, 2  ;;  %v463_v55 = vrot.slane %v461_v18, 1  ;;  %v5534_v34 = vld [vmem:[%s6254_s1 + $0xe] sm:$0x3] }
  0x41   : > { %4510 = vmatmul.mubr.msk.bf16.gmra.mrb[12].mxu0 %vm497_vm2, %v1788_v4  ;;  %v456_v47 = vsel %vm348_vm1, %v451_v37, %v455_v38  ;;  %v2687_v28 = vsel %vm552_vm0, %v5387_v1, 0  ;;  %v459_v57 = vor.u32 %v457_v46, %v455_v38  ;;  %v2160_v60 = vsel %vm2155_vm4, %v2157_v30, %v2159_v45  ;;  %v5528_v4 = vld [vmem:[%s5302_s11 + $0x88] sm:$0xff]  }
  0x42   : > { %4513 = vmatprep.mubr.msk.bf16.mxu0 %vm497_vm2, %v1797_v12  ;;  %v467_v61 = vor.u32 %v465_v50, %v463_v55  ;;  %v471_v3 = vrot.slane %v469_v52, 1  ;;  %v2162_v5 = vsel %vm2155_vm4, %v2159_v45, %v2161_v53  ;;  %v477_v7 = vshll.u32 %v5521_v56, 16 }
  0x43   : > { %v464_v1 = vsel %vm348_vm1, %v459_v57, %v463_v55  ;;  %v2163_v12 = vrot.slane %v5365_v49, 2  ;;  %v473_v16 = vshrl.u32 %v5506_v40, 16  ;;  %v485_v22 = vshll.u32 %v5528_v4, 16  ;;  %v5578_v55 = vld [vmem:[%s5302_s11 + $0x60] sm:$0xff]   ;;  %v5597_v57 = vld [vmem:[%s5302_s11 + $0x68] sm:$0xff]  }
  0x44   : > { %v472_v17 = vsel %vm348_vm1, %v467_v61, %v471_v3  ;;  %v479_v26 = vrot.slane %v477_v7, 1  ;;  %v493_v37 = vshll.u32 %v5551_v27, 16  ;;  %v2167_v38 = vrot.slane %v5401_v23, 2  ;;  %v5615_v7 = vld [vmem:[%s5302_s11 + $0x78] sm:$0xff]  }
  0x45   : > { %v475_v49 = vor.u32 %v473_v16, %v471_v3  ;;  %v2164_v13 = vsel %vm2155_vm4, %v2161_v53, %v2163_v12  ;;  %v487_v31 = vrot.slane %v485_v22, 1  ;;  %v2169_v18 = vrot.slane %v5421_v44, 2  ;;  %v5631_v22 = vld [vmem:[%s5302_s11 + $0x88] sm:$0xff]  }
  0x46   : > { %4362 = vmatmul.mubr.msk.bf16.gmra.mrb[16].mxu1 %vm497_vm2, %v432_v21  ;;  %v481_v21 = vshrl.u32 %v5521_v56, 16  ;;  %v495_v45 = vrot.slane %v493_v37, 1  ;;  %v2171_v23 = vrot.slane %v5434_v62, 2  ;;  %v2173_v44 = vrot.slane %v5446_v14, 2 }
  0x47   : > { %4365 = vmatprep.mubr.msk.bf16.mxu1 %vm497_vm2, %v440_v24  ;;  %v2165_v24 = vrot.slane %v5377_v59, 2  ;;  %v480_v59 = vsel %vm348_vm1, %v475_v49, %v479_v26  ;;  %v2175_v62 = vrot.slane %v5459_v29, 2  ;;  %v1048_v14 = vsel %vm552_vm0, %v5353_v39, 0 }
  0x48   : > { %v483_v30 = vor.u32 %v481_v21, %v479_v26  ;;  %v2172_v52 = vsel %vm2155_vm4, %v2169_v18, %v2171_v23  ;;  %v2174_v53 = vsel %vm2155_vm4, %v2171_v23, %v2173_v44  ;;  %v2179_v61 = vrot.slane %v5597_v57, 2  ;;  %v5635_v26 = vld [vmem:[%s5302_s11 + $0x90] sm:$0xff]  }
  0x49   : > { %4514 = vmatmul.mubr.msk.bf16.gmra.mrb[16].mxu0 %vm497_vm2, %v1806_v36  ;;  %v2166_v6 = vsel %vm2155_vm4, %v2163_v12, %v2165_v24  ;;  %v489_v36 = vshrl.u32 %v5528_v4, 16  ;;  %v2168_v46 = vsel %vm2155_vm4, %v2165_v24, %v2167_v38  ;;  %v2176_v29 = vsel %vm2155_vm4, %v2173_v44, %v2175_v62  ;;  %v5619_v12 = vld [vmem:[%s5302_s11 + $0x80] sm:$0xff]  }
  0x4a   : > { %4535 = vmatprep.mubr.msk.bf16.mxu0 %vm497_vm2, %v2158_v42  ;;  %v488_v42 = vsel %vm348_vm1, %v483_v30, %v487_v31  ;;  %v2183_v16 = vrot.slane %v5615_v7, 2  ;;  %v2187_v49 = vrot.slane %v5631_v22, 2  ;;  %v2463_v30 = vld [vmem:[%s5302_s11 + $0x10] sm:$0xc] }
  0x4e   : > { %4366 = vmatmul.mubr.msk.bf16.gmra.mrb[20].mxu1 %vm497_vm2, %v448_v43  ;;  %v491_v43 = vor.u32 %v489_v36, %v487_v31  ;;  %v5645_v31 = vld [vmem:[%s5302_s11 + $0x14] sm:$0xf] }
  0x4f   : > { %4369 = vmatprep.mubr.msk.bf16.mxu1 %vm497_vm2, %v456_v47  ;;  %v2170_v47 = vsel %vm2155_vm4, %v2167_v38, %v2169_v18  ;;  %v5655_v37 = vcombine.low %v2463_v30, %v5645_v31  ;;  %v5658_v38 = vld [vmem:[%s5302_s11 + $0x18] sm:$0xff]  }
  0x50   : > { %v496_v50 = vsel %vm348_vm1, %v491_v43, %v495_v45  ;;  %v2596_v43 = vrot.slane %v5658_v38, 2 }
  0x51   : > { %4536 = vmatmul.mubr.msk.bf16.vlgmr.msra.gmra.mrb[0].mxu0 %vm497_vm2, %v2160_v60  ;;  %v5603_v60 = vld [vmem:[%s5302_s11 + $0x70] sm:$0xff]   ;;  %v2595_v18 = vrot.slane %v5655_v37, 2 }
  0x52   : > { %4572 = vmatpush3.bf16.msra.mxu0 %v2687_v28  ;;  %4539 = vmatprep.mubr.msk.bf16.mxu0 %vm497_vm2, %v2162_v5  ;;  %v2177_v28 = vrot.slane %v5578_v55, 2  ;;  %v2181_v3 = vrot.slane %v5603_v60, 2 }
  0x53   : > { %4983 = vmatprep.subr.msk.bf16.mxu0 %vm552_vm0, %v5534_v34 }
  0x54   : > { %v2178_v39 = vsel %vm2155_vm4, %v2175_v62, %v2177_v28  ;;  %v2180_v5 = vsel %vm2155_vm4, %v2177_v28, %v2179_v61  ;;  %v2184_v21 = vsel %vm2155_vm4, %v2181_v3, %v2183_v16  ;;  %v3134_v62 = vsel %vm552_vm0, %v5534_v34, 0  ;;  %v5693_v28 = vld [vmem:[%s5302_s11 + $0x38] sm:$0xff]  }
  0x56   : > { %4370 = vmatmul.mubr.msk.bf16.gmra.mrb[24].mxu1 %vm497_vm2, %v464_v1  ;;  %v2182_v1 = vsel %vm2155_vm4, %v2179_v61, %v2181_v3  ;;  %v2604_v61 = vrot.slane %v5693_v28, 2  ;;  %v5712_v3 = vld [vmem:[%s5302_s11 + $0x40] sm:$0xff]  }
  0x57   : > { %4373 = vmatprep.mubr.msk.bf16.mxu1 %vm497_vm2, %v472_v17  ;;  %v2185_v17 = vrot.slane %v5619_v12, 2 }
  0x59   : > { %4540 = vmatmul.mubr.msk.bf16.gmra.mrb[4].mxu0 %vm497_vm2, %v2164_v13  ;;  %v2186_v24 = vsel %vm2155_vm4, %v2183_v16, %v2185_v17  ;;  %v2189_v13 = vrot.slane %v5635_v26, 2  ;;  %v949_v16 = vld [vmem:[%s5302_s11] sm:$0xe] }
  0x5a   : > { %4543 = vmatprep.mubr.msk.bf16.mxu0 %vm497_vm2, %v2166_v6  ;;  %v2188_v6 = vsel %vm2155_vm4, %v2185_v17, %v2187_v49  ;;  %v2606_v17 = vrot.slane %v5712_v3, 2 }
  0x5b   : > { %v2190_v36 = vsel %vm2155_vm4, %v2187_v49, %v2189_v13 }
  0x5c   : > { %v2607_v49 = vsel %vm2155_vm4, %v2604_v61, %v2606_v17 }
  0x5e   : > { %4374 = vmatmul.mubr.msk.bf16.gmra.mrb[28].mxu1 %vm497_vm2, %v480_v59  ;;  %v5651_v59 = vld [vmem:[%s5302_s11 + $0x98] ss:$0 sps:$4 sm:$0x33]  }
  0x5f   : > { %4377 = vmatprep.mubr.msk.bf16.mxu1 %vm497_vm2, %v488_v42  ;;  %v2191_v42 = vrot.slane %v5651_v59, 2 }
  0x61   : > { %4544 = vmatmul.mubr.msk.bf16.gmra.mrb[8].mxu0 %vm497_vm2, %v2168_v46  ;;  %v2192_v45 = vsel %vm2155_vm4, %v2189_v13, %v2191_v42  ;;  %v5671_v46 = vld [vmem:[%s5302_s11 + $0x20] sm:$0xff]   ;;  %v5730_v13 = vld [vmem:[%s5302_s11 + $0x50] sm:$0xff]  }
  0x62   : > { %4547 = vmatprep.mubr.msk.bf16.mxu0 %vm497_vm2, %v2170_v47  ;;  %v2597_v47 = vsel %vm2155_vm4, %v2595_v18, %v2596_v43  ;;  %v2598_v23 = vrot.slane %v5671_v46, 2  ;;  %v2610_v42 = vrot.slane %v5730_v13, 2 }
  0x66   : > { %4378 = vmatmul.mubr.msk.bf16.gmra.mrb[32].mxu1 %vm497_vm2, %v496_v50  ;;  %v5675_v50 = vld [vmem:[%s5302_s11 + $0x28] sm:$0xff]  }
  0x67   : > { %4383 = vmatprep.mubr.msk.bf16.mxu1 %vm497_vm2, %v5312_v9  ;;  %v5589_v9 = vld [vmem:[%s6254_s1 + $0x6] sm:$0x3]  ;;  %v2600_v44 = vrot.slane %v5675_v50, 2 }
  0x69   : > { %4548 = vmatmul.mubr.msk.bf16.gmra.mrb[12].mxu0 %vm497_vm2, %v2172_v52  ;;  %v2599_v52 = vsel %vm2155_vm4, %v2596_v43, %v2598_v23 }
  0x6a   : > { %4551 = vmatprep.mubr.msk.bf16.mxu0 %vm497_vm2, %v2174_v53  ;;  %v5687_v53 = vld [vmem:[%s5302_s11 + $0x30] sm:$0xff]  }
  0x6e   : > { %4384 = vmatmul.mubr.msk.bf16.vlgmr.msra.gmra.mrb[0].mxu1 %vm497_vm2, %v5315_v10 }
  0x6f   : > { %4387 = vmatprep.mubr.msk.bf16.mxu1 %vm497_vm2, %v5330_v19  ;;  %4420 = vmatpush3.bf16.msra.mxu1 %v1048_v14  ;;  %v2601_v14 = vsel %vm2155_vm4, %v2598_v23, %v2600_v44  ;;  %v961_v23 = vrot.slane %v5344_v33, 1 }
  0x70   : > { %4978 = vmatprep.subr.msk.bf16.mxu1 %vm552_vm0, %v5589_v9 }
  0x71   : > { %4552 = vmatmul.mubr.msk.bf16.gmra.mrb[16].mxu0 %vm497_vm2, %v2176_v29  ;;  %v5698_v29 = vld [vmem:[%s6254_s1 + $0x10] sm:$0x3] }
  0x72   : > { %4555 = vmatprep.mubr.msk.bf16.mxu0 %vm497_vm2, %v2178_v39  ;;  %v2602_v39 = vrot.slane %v5687_v53, 2 }
  0x74   : > { %v2603_v34 = vsel %vm2155_vm4, %v2600_v44, %v2602_v39 }
  0x76   : > { %4388 = vmatmul.mubr.msk.bf16.gmra.mrb[4].mxu1 %vm497_vm2, %v5344_v33 }
  0x77   : > { %4391 = vmatprep.mubr.msk.bf16.mxu1 %vm497_vm2, %v5362_v48 }
  0x79   : > { %4556 = vmatmul.mubr.msk.bf16.gmra.mrb[20].mxu0 %vm497_vm2, %v2180_v5  ;;  %v2605_v5 = vsel %vm2155_vm4, %v2602_v39, %v2604_v61  ;;  %v1487_v39 = vsel %vm552_vm0, %v5589_v9, 0  ;;  %v963_v61 = vrot.slane %v5362_v48, 1  ;;  %v5107_v9 = vld [vmem:[%s6254_s1 + $0x8] sm:$0x3] }
  0x7a   : > { %4559 = vmatprep.mubr.msk.bf16.mxu0 %vm497_vm2, %v2182_v1  ;;  %v5716_v1 = vld [vmem:[%s5302_s11 + $0x48] sm:$0xff]  }
  0x7b   : > { %v964_v48 = vsel %vm955_vm5, %v961_v23, %v963_v61 }
  0x7e   : > { %4392 = vmatmul.mubr.msk.bf16.gmra.mrb[8].mxu1 %vm497_vm2, %v5371_v54 }
  0x7f   : > { %4395 = vmatprep.mubr.msk.bf16.mxu1 %vm497_vm2, %v5382_v0 }
  0x81   : > { %4560 = vmatmul.mubr.msk.bf16.gmra.mrb[24].mxu0 %vm497_vm2, %v2184_v21  ;;  %v3993_v21 = vcombine.low %v949_v16, %v5309_v8  ;;  %v5735_v8 = vld [vmem:[%s5302_s11 + $0x58] sm:$0xff]   ;;  %v965_v16 = vrot.slane %v5371_v54, 1 }
  0x82   : > { %4563 = vmatprep.mubr.msk.bf16.mxu0 %vm497_vm2, %v2186_v24  ;;  %v2608_v24 = vrot.slane %v5716_v1, 2  ;;  %v2612_v43 = vrot.slane %v5735_v8, 2 }
  0x83   : > { %v956_v30 = vrot.slane %v3993_v21, 1  ;;  %v5777_v21 = vld [vmem:[%s5302_s11 + $0x78] sm:$0xff]   ;;  %v966_v54 = vsel %vm955_vm5, %v963_v61, %v965_v16 }
  0x84   : > { %v2613_v44 = vsel %vm2155_vm4, %v2610_v42, %v2612_v43 }
  0x86   : > { %4396 = vmatmul.mubr.msk.bf16.gmra.mrb[12].mxu1 %vm497_vm2, %v5410_v35 }
  0x87   : > { %4399 = vmatprep.mubr.msk.bf16.mxu1 %vm497_vm2, %v5426_v51 }
  0x89   : > { %4564 = vmatmul.mubr.msk.bf16.gmra.mrb[28].mxu0 %vm497_vm2, %v2188_v6  ;;  %v957_v6 = vrot.slane %v5315_v10, 1  ;;  %v959_v10 = vrot.slane %v5330_v19, 1 }
  0x8a   : > { %4567 = vmatprep.mubr.msk.bf16.mxu0 %vm497_vm2, %v2190_v36  ;;  %v2609_v36 = vsel %vm2155_vm4, %v2606_v17, %v2608_v24 }
  0x8b   : > { %v958_v18 = vsel %vm955_vm5, %v956_v30, %v957_v6  ;;  %v967_v30 = vrot.slane %v5382_v0, 1 }
  0x8e   : > { %4400 = vmatmul.mubr.msk.bf16.gmra.mrb[16].mxu1 %vm497_vm2, %v5437_v63 }
  0x8f   : > { %4403 = vmatprep.mubr.msk.bf16.mxu1 %vm497_vm2, %v5454_v25 }
  0x91   : > { %4568 = vmatmul.mubr.msk.bf16.gmra.mrb[32].mxu0 %vm497_vm2, %v2192_v45  ;;  %v2611_v45 = vsel %vm2155_vm4, %v2608_v24, %v2610_v42  ;;  %v969_v42 = vrot.slane %v5410_v35, 1  ;;  %v971_v35 = vrot.slane %v5426_v51, 1 }
  0x92   : > { %4573 = vmatprep.mubr.msk.bf16.mxu0 %vm497_vm2, %v2597_v47  ;;  %v5748_v47 = vld [vmem:[%s5302_s11 + $0x60] sm:$0xff]  }
  0x93   : > { %v2614_v19 = vrot.slane %v5748_v47, 2 }
  0x96   : > { %4404 = vmatmul.mubr.msk.bf16.gmra.mrb[20].mxu1 %vm497_vm2, %v5464_v41 }
  0x97   : > { %4407 = vmatprep.mubr.msk.bf16.mxu1 %vm497_vm2, %v5478_v58 }
  0x99   : > { %4574 = vmatmul.mubr.msk.bf16.vlgmr.msra.gmra.mrb[0].mxu0 %vm497_vm2, %v2599_v52  ;;  %v5753_v52 = vld [vmem:[%s5302_s11 + $0x68] sm:$0xff]  }
  0x9a   : > { %4610 = vmatpush3.bf16.msra.mxu0 %v3134_v62  ;;  %4577 = vmatprep.mubr.msk.bf16.mxu0 %vm497_vm2, %v2601_v14  ;;  %v960_v62 = vsel %vm955_vm5, %v957_v6, %v959_v10  ;;  %v962_v14 = vsel %vm955_vm5, %v959_v10, %v961_v23  ;;  %v2616_v33 = vrot.slane %v5753_v52, 2  ;;  %v968_v10 = vsel %vm955_vm5, %v965_v16, %v967_v30 }
  0x9b   : > { %4984 = vmatprep.subr.msk.bf16.mxu0 %vm552_vm0, %v5698_v29  ;;  %v2910_v16 = vshrl.u32 %v5655_v37, 16 }
  0x9c   : > { %v2617_v17 = vsel %vm2155_vm4, %v2614_v19, %v2616_v33 }
  0x9e   : > { %4408 = vmatmul.mubr.msk.bf16.gmra.mrb[24].mxu1 %vm497_vm2, %v5483_v11 }
  0x9f   : > { %4411 = vmatprep.mubr.msk.bf16.mxu1 %vm497_vm2, %v5500_v32 }
  0xa1   : > { %4578 = vmatmul.mubr.msk.bf16.gmra.mrb[4].mxu0 %vm497_vm2, %v2603_v34  ;;  %v2615_v34 = vsel %vm2155_vm4, %v2612_v43, %v2614_v19  ;;  %v5795_v43 = vld [vmem:[%s5302_s11 + $0x88] sm:$0xff]   ;;  %v973_v19 = vrot.slane %v5437_v63, 1  ;;  %v2913_v63 = vshll.u32 %v5655_v37, 16 }
  0xa2   : > { %4581 = vmatprep.mubr.msk.bf16.mxu0 %vm497_vm2, %v2605_v5  ;;  %v5768_v5 = vld [vmem:[%s5302_s11 + $0x70] sm:$0xff]   ;;  %v2624_v23 = vrot.slane %v5795_v43, 2 }
  0xa3   : > { %v2618_v24 = vrot.slane %v5768_v5, 2  ;;  %v974_v51 = vsel %vm955_vm5, %v971_v35, %v973_v19 }
  0xa5   : > { %v2619_v6 = vsel %vm2155_vm4, %v2616_v33, %v2618_v24  ;;  %v972_v33 = vsel %vm955_vm5, %v969_v42, %v971_v35 }
  0xa6   : > { %4412 = vmatmul.mubr.msk.bf16.gmra.mrb[28].mxu1 %vm497_vm2, %v5506_v40 }
  0xa7   : > { %4415 = vmatprep.mubr.msk.bf16.mxu1 %vm497_vm2, %v5521_v56 }
  0xa9   : > { %4582 = vmatmul.mubr.msk.bf16.gmra.mrb[8].mxu0 %vm497_vm2, %v2607_v49  ;;  %v2620_v49 = vrot.slane %v5777_v21, 2 }
  0xaa   : > { %4585 = vmatprep.mubr.msk.bf16.mxu0 %vm497_vm2, %v2609_v36  ;;  %v5790_v36 = vld [vmem:[%s5302_s11 + $0x80] sm:$0xff]  }
  0xab   : > { %v2622_v0 = vrot.slane %v5790_v36, 2 }
  0xae   : > { %4416 = vmatmul.mubr.msk.bf16.gmra.mrb[32].mxu1 %vm497_vm2, %v5528_v4 }
  0xaf   : > { %4421 = vmatprep.mubr.msk.bf16.mxu1 %vm497_vm2, %v958_v18  ;;  %v2621_v18 = vsel %vm2155_vm4, %v2618_v24, %v2620_v49 }
  0xb1   : > { %4586 = vmatmul.mubr.msk.bf16.gmra.mrb[12].mxu0 %vm497_vm2, %v2611_v45  ;;  %v970_v45 = vsel %vm955_vm5, %v967_v30, %v969_v42  ;;  %v977_v30 = vrot.slane %v5464_v41, 1  ;;  %v2915_v42 = vrot.slane %v2913_v63, 3  ;;  %v2936_v41 = vshrl.u32 %v5675_v50, 16 }
  0xb2   : > { %4589 = vmatprep.mubr.msk.bf16.mxu0 %vm497_vm2, %v2613_v44  ;;  %v2623_v44 = vsel %vm2155_vm4, %v2620_v49, %v2622_v0  ;;  %v5103_v49 = vld [vmem:[%s5302_s11 + $0xa0] ss:$0 sps:$4 sm:$0x33]  }
  0xb6   : > { %4422 = vmatmul.mubr.msk.bf16.vlgmr.msra.gmra.mrb[0].mxu1 %vm497_vm2, %v960_v62  ;;  %v5808_v62 = vld [vmem:[%s5302_s11 + $0x90] sm:$0xff]  }
  0xb7   : > { %4425 = vmatprep.mubr.msk.bf16.mxu1 %vm497_vm2, %v962_v14  ;;  %4458 = vmatpush3.bf16.msra.mxu1 %v1487_v39  ;;  %v5812_v14 = vld [vmem:[%s5302_s11 + $0x98] sm:$0xff]   ;;  %v2625_v39 = vsel %vm2155_vm4, %v2622_v0, %v2624_v23  ;;  %v2626_v61 = vrot.slane %v5808_v62, 2  ;;  %v2630_v0 = vrot.slane %v5103_v49, 2 }
  0xb8   : > { %4980 = vmatprep.subr.msk.bf16.mxu1 %vm552_vm0, %v5107_v9  ;;  %v2918_v9 = vshrl.u32 %v5658_v38, 16 }
  0xb9   : > { %4590 = vmatmul.mubr.msk.bf16.gmra.mrb[16].mxu0 %vm497_vm2, %v2615_v34  ;;  %v2628_v34 = vrot.slane %v5812_v14, 2  ;;  %v2627_v24 = vsel %vm2155_vm4, %v2624_v23, %v2626_v61  ;;  %v2930_v23 = vshll.u32 %v5671_v46, 16 }
  0xba   : > { %4593 = vmatprep.mubr.msk.bf16.mxu0 %vm497_vm2, %v2617_v17  ;;  %v2921_v17 = vshll.u32 %v5658_v38, 16  ;;  %v2920_v37 = vrot.slane %v2918_v9, 2  ;;  %v2938_v9 = vrot.slane %v2936_v41, 2  ;;  %v2963_v41 = vshrl.u32 %v5712_v3, 16 }
  0xbe   : > { %4426 = vmatmul.mubr.msk.bf16.gmra.mrb[4].mxu1 %vm497_vm2, %v964_v48  ;;  %v975_v48 = vrot.slane %v5454_v25, 1 }
  0xbf   : > { %4429 = vmatprep.mubr.msk.bf16.mxu1 %vm497_vm2, %v966_v54  ;;  %v2629_v54 = vsel %vm2155_vm4, %v2626_v61, %v2628_v34 }
  0xc0   : > { %v978_v25 = vsel %vm955_vm5, %v975_v48, %v977_v30 }
  0xc1   : > { %4594 = vmatmul.mubr.msk.bf16.gmra.mrb[20].mxu0 %vm497_vm2, %v2619_v6  ;;  %v2912_v6 = vrot.slane %v2910_v16, 2  ;;  %v981_v16 = vrot.slane %v5483_v11, 1  ;;  %v2954_v11 = vshrl.u32 %v5693_v28, 16 }
  0xc2   : > { %4597 = vmatprep.mubr.msk.bf16.mxu0 %vm497_vm2, %v2621_v18  ;;  %v2923_v18 = vrot.slane %v2921_v17, 3 }
  0xc3   : > { %v2916_v35 = vor.u32 %v2915_v42, %v2912_v6  ;;  %v2957_v6 = vshll.u32 %v5693_v28, 16 }
  0xc6   : > { %4430 = vmatmul.mubr.msk.bf16.gmra.mrb[8].mxu1 %vm497_vm2, %v968_v10  ;;  %v976_v10 = vsel %vm955_vm5, %v973_v19, %v975_v48  ;;  %v979_v19 = vrot.slane %v5478_v58, 1  ;;  %v2945_v58 = vshrl.u32 %v5687_v53, 16 }
  0xc7   : > { %4433 = vmatprep.mubr.msk.bf16.mxu1 %vm497_vm2, %v970_v45  ;;  %v2927_v45 = vshrl.u32 %v5671_v46, 16 }
  0xc8   : > { %v980_v48 = vsel %vm955_vm5, %v977_v30, %v979_v19  ;;  %v983_v30 = vrot.slane %v5500_v32, 1  ;;  %v2966_v32 = vshll.u32 %v5712_v3, 16 }
  0xc9   : > { %4598 = vmatmul.mubr.msk.bf16.gmra.mrb[24].mxu0 %vm497_vm2, %v2623_v44  ;;  %v2924_v44 = vor.u32 %v2923_v18, %v2920_v37  ;;  %v2929_v61 = vrot.slane %v2927_v45, 2  ;;  %v2947_v37 = vrot.slane %v2945_v58, 2  ;;  %v2956_v45 = vrot.slane %v2954_v11, 2 }
  0xca   : > { %4601 = vmatprep.mubr.msk.bf16.mxu0 %vm497_vm2, %v2625_v39  ;;  %v2939_v39 = vshll.u32 %v5675_v50, 16  ;;  %v2981_v58 = vshrl.u32 %v5730_v13, 16  ;;  %v2993_v11 = vshll.u32 %v5735_v8, 16 }
  0xcb   : > { %v2925_v63 = vsel %vm2908_vm6, %v2916_v35, %v2924_v44  ;;  %v984_v35 = vsel %vm955_vm5, %v981_v16, %v983_v30 }
  0xcc   : > { %v2941_v17 = vrot.slane %v2939_v39, 3 }
  0xce   : > { %4434 = vmatmul.mubr.msk.bf16.gmra.mrb[12].mxu1 %vm497_vm2, %v972_v33  ;;  %v2631_v33 = vsel %vm2155_vm4, %v2628_v34, %v2630_v0  ;;  %v2948_v34 = vshll.u32 %v5687_v53, 16  ;;  %v2942_v49 = vor.u32 %v2941_v17, %v2938_v9  ;;  %v3448_v0 = vsel %vm552_vm0, %v5698_v29, 0 }
  0xcf   : > { %4437 = vmatprep.mubr.msk.bf16.mxu1 %vm497_vm2, %v974_v51  ;;  %v2932_v51 = vrot.slane %v2930_v23, 3  ;;  %v2959_v23 = vrot.slane %v2957_v6, 3  ;;  %v2972_v29 = vshrl.u32 %v5716_v1, 16 }
  0xd0   : > { %v2950_v18 = vrot.slane %v2948_v34, 3  ;;  %v2984_v34 = vshll.u32 %v5730_v13, 16 }
  0xd1   : > { %4602 = vmatmul.mubr.msk.bf16.gmra.mrb[28].mxu0 %vm497_vm2, %v2627_v24  ;;  %v2933_v24 = vor.u32 %v2932_v51, %v2929_v61  ;;  %v2960_v39 = vor.u32 %v2959_v23, %v2956_v45  ;;  %v2965_v61 = vrot.slane %v2963_v41, 2  ;;  %v2968_v51 = vrot.slane %v2966_v32, 3 }
  0xd2   : > { %4605 = vmatprep.mubr.msk.bf16.mxu0 %vm497_vm2, %v2629_v54  ;;  %v982_v54 = vsel %vm955_vm5, %v979_v19, %v981_v16  ;;  %v2975_v19 = vshll.u32 %v5716_v1, 16  ;;  %v2974_v17 = vrot.slane %v2972_v29, 2  ;;  %v2995_v23 = vrot.slane %v2993_v11, 3  ;;  %v5109_v29 = vld [vmem:[%s5302_s11 + $0x18] sm:$0xff]  }
  0xd3   : > { %v2934_v42 = vsel %vm2908_vm6, %v2924_v44, %v2933_v24  ;;  %v2951_v44 = vor.u32 %v2950_v18, %v2947_v37  ;;  %v2986_v37 = vrot.slane %v2984_v34, 3  ;;  %v1395_v18 = vrot.slane %v5333_v20, 1 }
  0xd4   : > { %v2999_v32 = vshrl.u32 %v5748_v47, 16  ;;  %v3002_v20 = vshll.u32 %v5748_v47, 16  ;;  %v3020_v34 = vshll.u32 %v5768_v5, 16  ;;  %v3029_v11 = vshll.u32 %v5777_v21, 16 }
  0xd5   : > { %v2952_v16 = vsel %vm2908_vm6, %v2942_v49, %v2951_v44  ;;  %v2961_v9 = vsel %vm2908_vm6, %v2951_v44, %v2960_v39 }
  0xd6   : > { %4438 = vmatmul.mubr.msk.bf16.gmra.mrb[16].mxu1 %vm497_vm2, %v976_v10  ;;  %v985_v10 = vrot.slane %v5506_v40, 1 }
  0xd7   : > { %4441 = vmatprep.mubr.msk.bf16.mxu1 %vm497_vm2, %v978_v25  ;;  %v2943_v25 = vsel %vm2908_vm6, %v2933_v24, %v2942_v49 }
  0xd8   : > { %v986_v40 = vsel %vm955_vm5, %v983_v30, %v985_v10  ;;  %v991_v30 = vrot.slane %v5551_v27, 1 }
  0xd9   : > { %4606 = vmatmul.mubr.msk.bf16.gmra.mrb[32].mxu0 %vm497_vm2, %v2631_v33  ;;  %v987_v33 = vrot.slane %v5521_v56, 1 }
  0xda   : > { %4611 = vmatprep.mubr.msk.bf16.mxu0 %vm497_vm2, %v2925_v63  ;;  %v989_v63 = vrot.slane %v5528_v4, 1  ;;  %v2990_v4 = vshrl.u32 %v5735_v8, 16 }
  0xdb   : > { %v988_v24 = vsel %vm955_vm5, %v985_v10, %v987_v33  ;;  %v5108_v10 = vld [vmem:[%s5302_s11 + $0x10] sm:$0xff]  }
  0xdc   : > { %v990_v56 = vsel %vm955_vm5, %v987_v33, %v989_v63  ;;  %v2992_v45 = vrot.slane %v2990_v4, 2  ;;  %v3026_v4 = vshrl.u32 %v5777_v21, 16 }
  0xde   : > { %4442 = vmatmul.mubr.msk.bf16.gmra.mrb[20].mxu1 %vm497_vm2, %v980_v48  ;;  %v2977_v48 = vrot.slane %v2975_v19, 3  ;;  %v2996_v44 = vor.u32 %v2995_v23, %v2992_v45  ;;  %v1398_v19 = vrot.slane %v5109_v29, 1  ;;  %v3028_v45 = vrot.slane %v3026_v4, 2 }
  0xdf   : > { %4445 = vmatprep.mubr.msk.bf16.mxu1 %vm497_vm2, %v982_v54  ;;  %v2969_v54 = vor.u32 %v2968_v51, %v2965_v61  ;;  %v3001_v61 = vrot.slane %v2999_v32, 2  ;;  %v3004_v51 = vrot.slane %v3002_v20, 3  ;;  %v3031_v23 = vrot.slane %v3029_v11, 3  ;;  %v5115_v11 = vld [vmem:[%s5302_s11 + $0x48] sm:$0xff]  }
  0xe0   : > { %v2978_v49 = vor.u32 %v2977_v48, %v2974_v17  ;;  %v3038_v32 = vshll.u32 %v5790_v36, 16  ;;  %v3065_v4 = vshll.u32 %v5812_v14, 16 }
  0xe1   : > { %4612 = vmatmul.mubr.msk.bf16.vlgmr.msra.gmra.mrb[0].mxu0 %vm497_vm2, %v2934_v42  ;;  %v2970_v6 = vsel %vm2908_vm6, %v2960_v39, %v2969_v54  ;;  %v2983_v42 = vrot.slane %v2981_v58, 2  ;;  %v3011_v39 = vshll.u32 %v5753_v52, 16  ;;  %v3017_v58 = vshrl.u32 %v5768_v5, 16 }
  0xe2   : > { %4648 = vmatpush3.bf16.msra.mxu0 %v3448_v0  ;;  %4615 = vmatprep.mubr.msk.bf16.mxu0 %vm497_vm2, %v2943_v25  ;;  %v1396_v0 = vrot.slane %v5108_v10, 1  ;;  %v2979_v25 = vsel %vm2908_vm6, %v2969_v54, %v2978_v49  ;;  %v3005_v54 = vor.u32 %v3004_v51, %v3001_v61  ;;  %v5112_v10 = vld [vmem:[%s5302_s11 + $0x30] sm:$0xff]   ;;  %v3032_v20 = vor.u32 %v3031_v23, %v3028_v45  ;;  %v5114_v51 = vld [vmem:[%s5302_s11 + $0x40] sm:$0xff]  }
  0xe3   : > { %v2987_v41 = vor.u32 %v2986_v37, %v2983_v42  ;;  %v3013_v48 = vrot.slane %v3011_v39, 3  ;;  %v3019_v37 = vrot.slane %v3017_v58, 2  ;;  %v5113_v39 = vld [vmem:[%s5302_s11 + $0x38] sm:$0xff]   ;;  %v3040_v61 = vrot.slane %v3038_v32, 3 }
  0xe4   : > { %v1397_v27 = vsel %vm955_vm5, %v1395_v18, %v1396_v0  ;;  %v3006_v42 = vsel %vm2908_vm6, %v2996_v44, %v3005_v54  ;;  %v3022_v18 = vrot.slane %v3020_v34, 3  ;;  %v1406_v29 = vrot.slane %v5113_v39, 1 }
  0xe5   : > { %v2988_v33 = vsel %vm2908_vm6, %v2978_v49, %v2987_v41  ;;  %v3056_v58 = vshll.u32 %v5808_v62, 16  ;;  %v3067_v23 = vrot.slane %v3065_v4, 3  ;;  %v3361_v4 = vrot.slane %v5675_v50, 3 }
  0xe6   : > { %4446 = vmatmul.mubr.msk.bf16.gmra.mrb[24].mxu1 %vm497_vm2, %v984_v35  ;;  %v992_v35 = vsel %vm955_vm5, %v989_v63, %v991_v30  ;;  %v3363_v50 = vrot.slane %v5687_v53, 3 }
  0xe7   : > { %4449 = vmatprep.mubr.msk.bf16.mxu1 %vm497_vm2, %v986_v40  ;;  %v3008_v40 = vshrl.u32 %v5753_v52, 16 }
  0xe9   : > { %4616 = vmatmul.mubr.msk.bf16.gmra.mrb[4].mxu0 %vm497_vm2, %v2952_v16  ;;  %v5110_v16 = vld [vmem:[%s5302_s11 + $0x20] sm:$0xff]   ;;  %v3010_v17 = vrot.slane %v3008_v40, 2  ;;  %v3047_v40 = vshll.u32 %v5795_v43, 16 }
  0xea   : > { %4619 = vmatprep.mubr.msk.bf16.mxu0 %vm497_vm2, %v2961_v9  ;;  %v1400_v63 = vrot.slane %v5110_v16, 1  ;;  %v2997_v9 = vsel %vm2908_vm6, %v2987_v41, %v2996_v44  ;;  %v3023_v41 = vor.u32 %v3022_v18, %v3019_v37  ;;  %v3044_v44 = vshrl.u32 %v5795_v43, 16  ;;  %v5116_v18 = vld [vmem:[%s5302_s11 + $0x50] sm:$0xff]  }
  0xeb   : > { %v3014_v49 = vor.u32 %v3013_v48, %v3010_v17  ;;  %v1408_v16 = vrot.slane %v5114_v51, 1  ;;  %v3049_v17 = vrot.slane %v3047_v40, 3  ;;  %v3058_v37 = vrot.slane %v3056_v58, 3  ;;  %v5117_v40 = vld [vmem:[%s5302_s11 + $0x58] sm:$0xff]  }
  0xec   : > { %v1414_v39 = vrot.slane %v5117_v40, 1  ;;  %v1817_v40 = vshrl.u32 %v5597_v57, 16 }
  0xee   : > { %4450 = vmatmul.mubr.msk.bf16.gmra.mrb[28].mxu1 %vm497_vm2, %v988_v24  ;;  %v1399_v24 = vsel %vm955_vm5, %v1396_v0, %v1398_v19  ;;  %v1404_v0 = vrot.slane %v5112_v10, 1  ;;  %v1412_v10 = vrot.slane %v5116_v18, 1  ;;  %v3365_v18 = vrot.slane %v5693_v28, 3 }
  0xef   : > { %4453 = vmatprep.mubr.msk.bf16.mxu1 %vm497_vm2, %v990_v56  ;;  %v1401_v56 = vsel %vm955_vm5, %v1398_v19, %v1400_v63  ;;  %v3024_v19 = vsel %vm2908_vm6, %v3014_v49, %v3023_v41 }
  0xf0   : > { %v1407_v48 = vsel %vm955_vm5, %v1404_v0, %v1406_v29  ;;  %v3366_v53 = vsel %vm3355_vm7, %v3363_v50, %v3365_v18 }
  0xf1   : > { %4620 = vmatmul.mubr.msk.bf16.gmra.mrb[8].mxu0 %vm497_vm2, %v2970_v6  ;;  %v5111_v6 = vld [vmem:[%s5302_s11 + $0x28] sm:$0xff]  }
  0xf2   : > { %4623 = vmatprep.mubr.msk.bf16.mxu0 %vm497_vm2, %v2979_v25  ;;  %v1402_v30 = vrot.slane %v5111_v6, 1  ;;  %v3015_v25 = vsel %vm2908_vm6, %v3005_v54, %v3014_v49  ;;  %v1409_v54 = vsel %vm955_vm5, %v1406_v29, %v1408_v16  ;;  %v3062_v49 = vshrl.u32 %v5812_v14, 16 }
  0xf3   : > { %v1410_v6 = vrot.slane %v5115_v11, 1  ;;  %v1422_v11 = vrot.slane %v5615_v7, 1 }
  0xf4   : > { %v3064_v45 = vrot.slane %v3062_v49, 2 }
  0xf6   : > { %4454 = vmatmul.mubr.msk.bf16.gmra.mrb[32].mxu1 %vm497_vm2, %v992_v35  ;;  %v1403_v35 = vsel %vm955_vm5, %v1400_v63, %v1402_v30  ;;  %v3033_v63 = vsel %vm2908_vm6, %v3023_v41, %v3032_v20 }
  0xf7   : > { %4459 = vmatprep.mubr.msk.bf16.mxu1 %vm497_vm2, %v1397_v27  ;;  %v3035_v27 = vshrl.u32 %v5790_v36, 16 }
  0xf9   : > { %4624 = vmatmul.mubr.msk.bf16.gmra.mrb[12].mxu0 %vm497_vm2, %v2988_v33  ;;  %v3037_v33 = vrot.slane %v3035_v27, 2 }
  0xfa   : > { %4627 = vmatprep.mubr.msk.bf16.mxu0 %vm497_vm2, %v2997_v9  ;;  %v3046_v9 = vrot.slane %v3044_v44, 2  ;;  %v3349_v44 = vld [vmem:[%s5302_s11 + $0x10] sm:$0x8] }
  0xfc   : > { %v3050_v34 = vor.u32 %v3049_v17, %v3046_v9 }
  0xfe   : > { %4460 = vmatmul.mubr.msk.bf16.vlgmr.msra.gmra.mrb[0].mxu1 %vm497_vm2, %v1399_v24  ;;  %v3041_v24 = vor.u32 %v3040_v61, %v3037_v33  ;;  %v1416_v61 = vrot.slane %v5578_v55, 1 }
  0xff   : > { %4463 = vmatprep.mubr.msk.bf16.mxu1 %vm497_vm2, %v1401_v56  ;;  %4686 = vmatpush3.bf16.msra.mxu1 %v5286_v2  ;;  %v1405_v2 = vsel %vm955_vm5, %v1402_v30, %v1404_v0  ;;  %v3053_v56 = vshrl.u32 %v5808_v62, 16  ;;  %v5948_v0 = vld [vmem:[%s5302_s11 + $0xa0] ss:$0 sps:$4 sm:$0x77]  }
 0x100   : > { %v3042_v30 = vsel %vm2908_vm6, %v3032_v20, %v3041_v24  ;;  %v3071_v27 = vshrl.u32 %v5948_v0, 16  ;;  %v3074_v32 = vshll.u32 %v5948_v0, 16  ;;  %v3068_v20 = vor.u32 %v3067_v23, %v3064_v45 }
 0x101   : > { %4628 = vmatmul.mubr.msk.bf16.gmra.mrb[16].mxu0 %vm497_vm2, %v3006_v42  ;;  %v3055_v42 = vrot.slane %v3053_v56, 2  ;;  %v1417_v17 = vsel %vm955_vm5, %v1414_v39, %v1416_v61  ;;  %v1420_v56 = vrot.slane %v5603_v60, 1  ;;  %v1428_v45 = vrot.slane %v5635_v26, 1 }
 0x102   : > { %4631 = vmatprep.mubr.msk.bf16.mxu0 %vm497_vm2, %v3015_v25  ;;  %v3051_v25 = vsel %vm2908_vm6, %v3041_v24, %v3050_v34  ;;  %v3076_v33 = vrot.slane %v3074_v32, 3  ;;  %v3357_v24 = vrot.slane %v5658_v38, 3  ;;  %v3359_v38 = vrot.slane %v5671_v46, 3 }
 0x103   : > { %v3059_v41 = vor.u32 %v3058_v37, %v3055_v42  ;;  %v1423_v46 = vsel %vm955_vm5, %v1420_v56, %v1422_v11  ;;  %v1808_v23 = vshrl.u32 %v5578_v55, 16 }
 0x104   : > { %v3362_v42 = vsel %vm3355_vm7, %v3359_v38, %v3361_v4 }
 0x105   : > { %v3060_v29 = vsel %vm2908_vm6, %v3050_v34, %v3059_v41  ;;  %v3069_v51 = vsel %vm2908_vm6, %v3059_v41, %v3068_v20  ;;  %v5106_v41 = vld [vmem:[%s5302_s11 + $0x98] ss:$0 sps:$4 sm:$0x11]   ;;  %v1810_v32 = vrot.slane %v1808_v23, 1  ;;  %s6115_s11 = scalar_lea.vmem [#allocation2], %s4985_s10 }
 0x106   : > { %4464 = vmatmul.mubr.msk.bf16.gmra.mrb[4].mxu1 %vm497_vm2, %v1403_v35  ;;  %v1411_v35 = vsel %vm955_vm5, %v1408_v16, %v1410_v6  ;;  %v4149_v16 = vcombine.low %v3349_v44, %v5645_v31  ;;  %v3369_v44 = vrot.slane %v5716_v1, 3  ;;  %s3829_s19 = sshll.u32 %s6115_s11, 4  ;;  %s6200_s19 = int_to_ptr.vmem [resolvable:$true] %s3829_s19 }
 0x107   : > { %4467 = vmatprep.mubr.msk.bf16.mxu1 %vm497_vm2, %v1405_v2  ;;  %v1413_v2 = vsel %vm955_vm5, %v1410_v6, %v1412_v10  ;;  %v3360_v6 = vsel %vm3355_vm7, %v3357_v24, %v3359_v38  ;;  %s5118_s27 = scalar_lea.vmem %s6200_s19, 4608  ;;  %p5125_p1 = scmp.lt.s32.totalorder %s6200_s19, %s5123_s29 }
 0x108   : > { %p5119_p12 = scmp.ne.s32.totalorder %s6200_s19, %s5118_s27  ;;  %p5126_p2 = scmp.lt.s32.totalorder %s5124_s30, %s5118_s27 }
 0x109   : > { %4632 = vmatmul.mubr.msk.bf16.gmra.mrb[20].mxu0 %vm497_vm2, %v3024_v19  ;;  %v3073_v19 = vrot.slane %v3071_v27, 2 }
 0x10a   : > { %4635 = vmatprep.mubr.msk.bf16.mxu0 %vm497_vm2, %v3033_v63  ;;  %v1415_v63 = vsel %vm955_vm5, %v1412_v10, %v1414_v39  ;;  %v1426_v10 = vrot.slane %v5631_v22, 1  ;;  %v1820_v39 = vshll.u32 %v5597_v57, 16  ;;  %p5120_p13 = pnand %p5119_p12, %p5261_p4  ;;  %p5127_p3 = por %p5126_p2, %p5125_p1 }
 0x10b   : > { %v3077_v9 = vor.u32 %v3076_v33, %v3073_v19  ;;  %v1829_v33 = vshll.u32 %v5603_v60, 16 }
 0x10c   : > { %v1429_v27 = vsel %vm955_vm5, %v1426_v10, %v1428_v45  ;;  %p5121_p0 = pneg %p5120_p13 }
 0x10d   : > { %v3078_v31 = vsel %vm2908_vm6, %v3068_v20, %v3077_v9 }
 0x10e   : > { %4468 = vmatmul.mubr.msk.bf16.gmra.mrb[8].mxu1 %vm497_vm2, %v1407_v48  ;;  %v3356_v48 = vrot.slane %v4149_v16, 3  ;;  %v1822_v16 = vrot.slane %v1820_v39, 2  ;;  %p5128_p5 = pnand %p5127_p3, %p5121_p0 }
 0x10f   : > { %4471 = vmatprep.mubr.msk.bf16.mxu1 %vm497_vm2, %v1409_v54  ;;  %v1418_v54 = vrot.slane %v5597_v57, 1 }
 0x110   : > { %v3358_v58 = vsel %vm3355_vm7, %v3356_v48, %v3357_v24  ;;  %v3373_v48 = vrot.slane %v5735_v8, 3  ;;  %v1835_v24 = vshrl.u32 %v5615_v7, 16 }
 0x111   : > { %4636 = vmatmul.mubr.msk.bf16.gmra.mrb[24].mxu0 %vm497_vm2, %v3042_v30  ;;  %v1419_v34 = vsel %vm955_vm5, %v1416_v61, %v1418_v54  ;;  %v1421_v49 = vsel %vm955_vm5, %v1418_v54, %v1420_v56  ;;  %v1424_v30 = vrot.slane %v5619_v12, 1  ;;  %v1838_v54 = vshll.u32 %v5615_v7, 16 }
 0x112   : > { %4639 = vmatprep.mubr.msk.bf16.mxu0 %vm497_vm2, %v3051_v25  ;;  %v3364_v25 = vsel %vm3355_vm7, %v3361_v4, %v3363_v50 }
 0x113   : > { %v1425_v37 = vsel %vm955_vm5, %v1422_v11, %v1424_v30  ;;  %v1427_v28 = vsel %vm955_vm5, %v1424_v30, %v1426_v10  ;;  %v1840_v38 = vrot.slane %v1838_v54, 2  ;;  %v1853_v30 = vshrl.u32 %v5631_v22, 16 }
 0x115   : > { %v1855_v10 = vrot.slane %v1853_v30, 1 }
 0x116   : > { %4472 = vmatmul.mubr.msk.bf16.gmra.mrb[12].mxu1 %vm497_vm2, %v1411_v35  ;;  %v1811_v35 = vshll.u32 %v5578_v55, 16  ;;  %v1430_v55 = vrot.slane %v5106_v41, 1  ;;  %v1874_v41 = vshll.u32 %v5651_v59, 16 }
 0x117   : > { %4475 = vmatprep.mubr.msk.bf16.mxu1 %vm497_vm2, %v1413_v2  ;;  %v3367_v2 = vrot.slane %v5712_v3, 3  ;;  %v1826_v3 = vshrl.u32 %v5603_v60, 16 }
 0x118   : > { %v1813_v20 = vrot.slane %v1811_v35, 2  ;;  %v1431_v1 = vsel %vm955_vm5, %v1428_v45, %v1430_v55  ;;  %v3379_v45 = vrot.slane %v5768_v5, 3 }
 0x119   : > { %4640 = vmatmul.mubr.msk.bf16.gmra.mrb[28].mxu0 %vm497_vm2, %v3060_v29  ;;  %v3368_v29 = vsel %vm3355_vm7, %v3365_v18, %v3367_v2  ;;  %v3370_v61 = vsel %vm3355_vm7, %v3367_v2, %v3369_v44  ;;  %v1828_v9 = vrot.slane %v1826_v3, 1  ;;  %v3389_v3 = vrot.slane %v5812_v14, 3 }
 0x11a   : > { %4643 = vmatprep.mubr.msk.bf16.mxu0 %vm497_vm2, %v3069_v51  ;;  %v1814_v19 = vor.u32 %v1813_v20, %v1810_v32  ;;  %v1819_v51 = vrot.slane %v1817_v40, 1  ;;  %v3385_v40 = vrot.slane %v5795_v43, 3 }
 0x11c   : > { %v1815_v57 = vsel %vm1708_vm3, %v5492_v15, %v1814_v19  ;;  %v1823_v60 = vor.u32 %v1822_v16, %v1819_v51  ;;  %v1847_v15 = vshll.u32 %v5619_v12, 16 }
 0x11e   : > { %4476 = vmatmul.mubr.msk.bf16.gmra.mrb[16].mxu1 %vm497_vm2, %v1415_v63  ;;  %v3371_v63 = vrot.slane %v5730_v13, 3  ;;  %v1844_v13 = vshrl.u32 %v5619_v12, 16  ;;  %v1824_v8 = vsel %vm1708_vm3, %v1814_v19, %v1823_v60  ;;  %v1849_v11 = vrot.slane %v1847_v15, 2 }
 0x11f   : > { %4479 = vmatprep.mubr.msk.bf16.mxu1 %vm497_vm2, %v1417_v17  ;;  %v1831_v17 = vrot.slane %v1829_v33, 2 }
 0x120   : > { %v1846_v4 = vrot.slane %v1844_v13, 1 }
 0x121   : > { %4644 = vmatmul.mubr.msk.bf16.gmra.mrb[32].mxu0 %vm497_vm2, %v3078_v31  ;;  %v3372_v31 = vsel %vm3355_vm7, %v3369_v44, %v3371_v63  ;;  %v1832_v56 = vor.u32 %v1831_v17, %v1828_v9  ;;  %v3383_v44 = vrot.slane %v5790_v36, 3  ;;  %v3387_v36 = vrot.slane %v5808_v62, 3 }
 0x122   : > { %4649 = vmatprep.mubr.msk.bf16.mxu0 %vm497_vm2, %v3358_v58  ;;  %v3374_v58 = vsel %vm3355_vm7, %v3371_v63, %v3373_v48  ;;  %v1850_v50 = vor.u32 %v1849_v11, %v1846_v4 }
 0x123   : > { %v1833_v7 = vsel %vm1708_vm3, %v1823_v60, %v1832_v56  ;;  %v3388_v43 = vsel %vm3355_vm7, %v3385_v40, %v3387_v36  ;;  %v3390_v33 = vsel %vm3355_vm7, %v3387_v36, %v3389_v3 }
 0x126   : > { %4480 = vmatmul.mubr.msk.bf16.gmra.mrb[20].mxu1 %vm497_vm2, %v1419_v34  ;;  %v1837_v34 = vrot.slane %v1835_v24, 1 }
 0x127   : > { %4483 = vmatprep.mubr.msk.bf16.mxu1 %vm497_vm2, %v1421_v49  ;;  %v3375_v49 = vrot.slane %v5748_v47, 3  ;;  %v1862_v47 = vshrl.u32 %v5635_v26, 16 }
 0x128   : > { %v1841_v12 = vor.u32 %v1840_v38, %v1837_v34 }
 0x129   : > { %4650 = vmatmul.mubr.msk.bf16.vlgmr.msra.gmra.mrb[0].mxu0 %vm497_vm2, %v3360_v6  ;;  %v3377_v6 = vrot.slane %v5753_v52, 3  ;;  %v1864_v23 = vrot.slane %v1862_v47, 1 }
 0x12a   : > { %4653 = vmatprep.mubr.msk.bf16.mxu0 %vm497_vm2, %v3362_v42  ;;  %v1856_v42 = vshll.u32 %v5631_v22, 16  ;;  %v1842_v52 = vsel %vm1708_vm3, %v1832_v56, %v1841_v12  ;;  %v1851_v22 = vsel %vm1708_vm3, %v1841_v12, %v1850_v50 }
 0x12b   : > { %v3378_v18 = vsel %vm3355_vm7, %v3375_v49, %v3377_v6  ;;  %v3380_v2 = vsel %vm3355_vm7, %v3377_v6, %v3379_v45 }
 0x12e   : > { %4484 = vmatmul.mubr.msk.bf16.gmra.mrb[24].mxu1 %vm497_vm2, %v1423_v46  ;;  %v3376_v46 = vsel %vm3355_vm7, %v3373_v48, %v3375_v49  ;;  %v6107_v49 = vld [vmem:[%s6255_s2] ss:$0 sm:$0xff] }
 0x12f   : > { %4487 = vmatprep.mubr.msk.bf16.mxu1 %vm497_vm2, %v1425_v37  ;;  %v1865_v37 = vshll.u32 %v5635_v26, 16 }
 0x131   : > { %4654 = vmatmul.mubr.msk.bf16.gmra.mrb[4].mxu0 %vm497_vm2, %v3364_v25  ;;  %v1858_v25 = vrot.slane %v1856_v42, 2  ;;  %v1867_v35 = vrot.slane %v1865_v37, 2 }
 0x132   : > { %4657 = vmatprep.mubr.msk.bf16.mxu0 %vm497_vm2, %v3366_v53  ;;  %v3381_v53 = vrot.slane %v5777_v21, 3  ;;  %v1876_v21 = vrot.slane %v1874_v41, 2 }
 0x133   : > { %v1859_v26 = vor.u32 %v1858_v25, %v1855_v10 }
 0x134   : > { %v3382_v5 = vsel %vm3355_vm7, %v3379_v45, %v3381_v53  ;;  %v3384_v39 = vsel %vm3355_vm7, %v3381_v53, %v3383_v44 }
 0x135   : > { %v1860_v32 = vsel %vm1708_vm3, %v1850_v50, %v1859_v26 }
 0x136   : > { %4488 = vmatmul.mubr.msk.bf16.gmra.mrb[28].mxu1 %vm497_vm2, %v1427_v28  ;;  %v1871_v28 = vshrl.u32 %v5651_v59, 16 }
 0x137   : > { %4491 = vmatprep.mubr.msk.bf16.mxu1 %vm497_vm2, %v1429_v27  ;;  %v1868_v27 = vor.u32 %v1867_v35, %v1864_v23 }
 0x138   : > { %v1873_v20 = vrot.slane %v1871_v28, 1 }
 0x139   : > { %4658 = vmatmul.mubr.msk.bf16.gmra.mrb[8].mxu0 %vm497_vm2, %v3368_v29  ;;  %v1869_v55 = vsel %vm1708_vm3, %v1859_v26, %v1868_v27  ;;  %v3386_v29 = vsel %vm3355_vm7, %v3383_v44, %v3385_v40 }
 0x13a   : > { %4661 = vmatprep.mubr.msk.bf16.mxu0 %vm497_vm2, %v3370_v61  ;;  %v1877_v59 = vor.u32 %v1876_v21, %v1873_v20  ;;  %v3391_v61 = vrot.slane %v5948_v0, 3 }
 0x13c   : > { %v1878_v19 = vsel %vm1708_vm3, %v1868_v27, %v1877_v59 }
 0x13e   : > { %4492 = vmatmul.mubr.msk.bf16.gmra.mrb[32].mxu1 %vm497_vm2, %v1431_v1  ;;  %v3392_v1 = vsel %vm3355_vm7, %v3389_v3, %v3391_v61 }
 0x13f   : > { %4517 = vmatprep.mubr.msk.bf16.mxu1 %vm497_vm2, %v1815_v57 }
 0x141   : > { %4662 = vmatmul.mubr.msk.bf16.gmra.mrb[12].mxu0 %vm497_vm2, %v3372_v31 }
 0x142   : > { %4665 = vmatprep.mubr.msk.bf16.mxu0 %vm497_vm2, %v3374_v58 }
 0x146   : > { %4518 = vmatmul.mubr.msk.bf16.vlgmr.msra.gmra.mrb[20].mxu1 %vm497_vm2, %v1824_v8 }
 0x147   : > { %4521 = vmatprep.mubr.msk.bf16.mxu1 %vm497_vm2, %v1833_v7 }
 0x149   : > { %4666 = vmatmul.mubr.msk.bf16.gmra.mrb[16].mxu0 %vm497_vm2, %v3376_v46 }
 0x14a   : > { %4669 = vmatprep.mubr.msk.bf16.mxu0 %vm497_vm2, %v3378_v18 }
 0x14e   : > { %4522 = vmatmul.mubr.msk.bf16.gmra.mrb[24].mxu1 %vm497_vm2, %v1842_v52 }
 0x14f   : > { %4525 = vmatprep.mubr.msk.bf16.mxu1 %vm497_vm2, %v1851_v22 }
 0x151   : > { %4670 = vmatmul.mubr.msk.bf16.gmra.mrb[20].mxu0 %vm497_vm2, %v3380_v2 }
 0x152   : > { %4673 = vmatprep.mubr.msk.bf16.mxu0 %vm497_vm2, %v3382_v5 }
 0x156   : > { %4526 = vmatmul.mubr.msk.bf16.gmra.mrb[28].mxu1 %vm497_vm2, %v1860_v32 }
 0x157   : > { %4529 = vmatprep.mubr.msk.bf16.mxu1 %vm497_vm2, %v1869_v55 }
 0x159   : > { %4674 = vmatmul.mubr.msk.bf16.gmra.mrb[24].mxu0 %vm497_vm2, %v3384_v39 }
 0x15a   : > { %4677 = vmatprep.mubr.msk.bf16.mxu0 %vm497_vm2, %v3386_v29 }
 0x15e   : > { %4530 = vmatmul.mubr.msk.bf16.gmra.mrb[32].mxu1 %vm497_vm2, %v1878_v19 }
 0x161   : > { %4678 = vmatmul.mubr.msk.bf16.gmra.mrb[28].mxu0 %vm497_vm2, %v3388_v43 }
 0x162   : > { %4681 = vmatprep.mubr.msk.bf16.mxu0 %vm497_vm2, %v3390_v33 }
 0x169   : > { %4682 = vmatmul.mubr.msk.bf16.gmra.mrb[32].mxu0 %vm497_vm2, %v3392_v1 }
 0x1d1   : > { %v4461_v51 = vpop.f32.mrb[0].mxu1 }
 0x1d2   : > { %v1523_v62 = vpop.f32.mrb[1].mxu1 }
 0x1d3   : > { %v4462_v16 = vpop.f32.mrb[2].mxu1 }
 0x1d4   : > { %v1526_v14 = vpop.f32.mrb[3].mxu1 }
 0x1d9   : > { %v4465_v63 = vpop.f32.mrb[4].mxu1 }
 0x1da   : > { %v1539_v57 = vpop.f32.mrb[5].mxu1 }
 0x1db   : > { %v4466_v9 = vpop.f32.mrb[6].mxu1 }
 0x1dc   : > { %v1542_v17 = vpop.f32.mrb[7].mxu1 }
 0x1e1   : > { %v4469_v48 = vpop.f32.mrb[8].mxu1 }
 0x1e2   : > { %v6081_v60 = vpop.f32.mrb[9].mxu1 }
 0x1e3   : > { %v6083_v24 = vpop.f32.mrb[10].mxu1 }
 0x1e4   : > { %v6085_v0 = vpop.f32.mrb[11].mxu1 }
 0x1e9   : > { %v6087_v54 = vpop.f32.mrb[12].mxu1 }
 0x1ea   : > { %v6089_v31 = vpop.f32.mrb[13].mxu1 }
 0x1eb   : > { %v6091_v56 = vpop.f32.mrb[14].mxu1 }
 0x1ec   : > { %v6093_v13 = vpop.f32.mrb[15].mxu1 }
 0x1f1   : > { %v6095_v15 = vpop.f32.mrb[16].mxu1 }
 0x1f2   : > { %v6097_v58 = vpop.f32.mrb[17].mxu1 }
 0x1f3   : > { %v6099_v8 = vpop.f32.mrb[18].mxu1 }
 0x1f4   : > { %v6101_v34 = vpop.f32.mrb[19].mxu1 }
 0x1fc   : > { %v4651_v38 = vpop.f32.mrb[0].mxu0 }
 0x1fd   : > { %v4687_v7 = vadd.f32 %v4651_v38, %v4461_v51  ;;  %v3484_v4 = vpop.f32.mrb[1].mxu0 }
 0x1fe   : > { %v4688_v11 = vadd.f32 %v3484_v4, %v1523_v62  ;;  %v4652_v6 = vpop.f32.mrb[2].mxu0 }
 0x1ff   : > { %v3672_v12 = vadd.f32 %v4687_v7, %v6107_v49  ;;  %v4689_v30 = vadd.f32 %v4652_v6, %v4462_v16  ;;  %v3487_v42 = vpop.f32.mrb[3].mxu0 }
 0x200   : > { %v3670_v46 = vadd.f32 %v4688_v11, %v6107_v49  ;;  %v4690_v50 = vadd.f32 %v3487_v42, %v1526_v14 }
 0x201   : > { %v3708_v47 = vmax.f32 %v3672_v12, 0.0  ;;  %v3673_v37 = vadd.f32 %v4689_v30, %v6107_v49 }
 0x202   : > { %v3706_v18 = vmax.f32 %v3670_v46, 0.0  ;;  %v3671_v52 = vadd.f32 %v4690_v50, %v6107_v49 }
 0x203   : > { %v3744_v10 = vmin.f32 %v3708_v47, 6.0  ;;  %v3709_v25 = vmax.f32 %v3673_v37, 0.0 }
 0x204   : > { %v3742_v45 = vmin.f32 %v3706_v18, 6.0  ;;  %v3707_v22 = vmax.f32 %v3671_v52, 0.0  ;;  %v4655_v23 = vpop.f32.mrb[4].mxu0 }
 0x205   : > { %3780 = vst [vmem:[%s6115_s11 + $0x10] sm:$0xff] %v3744_v10  ;;  %v3745_v35 = vmin.f32 %v3709_v25, 6.0  ;;  %v4691_v53 = vadd.f32 %v4655_v23, %v4465_v63  ;;  %v3500_v26 = vpop.f32.mrb[5].mxu0 }
 0x206   : > { %3778 = vst [vmem:[%s6115_s11] sm:$0xff] %v3742_v45  ;;  %v3743_v28 = vmin.f32 %v3707_v22, 6.0  ;;  %v4692_v41 = vadd.f32 %v3500_v26, %v1539_v57  ;;  %v4656_v2 = vpop.f32.mrb[6].mxu0 }
 0x207   : > { %3781 = vst [vmem:[%s6115_s11 + $0x18] sm:$0xff] %v3745_v35  ;;  %v3676_v27 = vadd.f32 %v4691_v53, %v6107_v49  ;;  %v4693_v5 = vadd.f32 %v4656_v2, %v4466_v9  ;;  %v3503_v32 = vpop.f32.mrb[7].mxu0 }
 0x208   : > { %3779 = vst [vmem:[%s6115_s11 + $0x8] sm:$0xff] %v3743_v28  ;;  %v3674_v20 = vadd.f32 %v4692_v41, %v6107_v49  ;;  %v4694_v21 = vadd.f32 %v3503_v32, %v1542_v17 }
 0x209   : > { %v3712_v44 = vmax.f32 %v3676_v27, 0.0  ;;  %v3677_v55 = vadd.f32 %v4693_v5, %v6107_v49 }
 0x20a   : > { %v3710_v40 = vmax.f32 %v3674_v20, 0.0  ;;  %v3675_v59 = vadd.f32 %v4694_v21, %v6107_v49 }
 0x20b   : > { %v3748_v39 = vmin.f32 %v3712_v44, 6.0  ;;  %v3713_v29 = vmax.f32 %v3677_v55, 0.0 }
 0x20c   : > { %v3746_v19 = vmin.f32 %v3710_v40, 6.0  ;;  %v3711_v36 = vmax.f32 %v3675_v59, 0.0  ;;  %v4659_v3 = vpop.f32.mrb[8].mxu0 }
 0x20d   : > { %3784 = vst [vmem:[%s6115_s11 + $0x30] sm:$0xff] %v3748_v39  ;;  %v3749_v43 = vmin.f32 %v3713_v29, 6.0  ;;  %v4695_v33 = vadd.f32 %v4659_v3, %v4469_v48  ;;  %v3516_v61 = vpop.f32.mrb[9].mxu0 }
 0x20e   : > { %3782 = vst [vmem:[%s6115_s11 + $0x20] sm:$0xff] %v3746_v19  ;;  %v3747_v1 = vmin.f32 %v3711_v36, 6.0  ;;  %v4696_v51 = vadd.f32 %v3516_v61, %v6081_v60  ;;  %v4660_v62 = vpop.f32.mrb[10].mxu0 }
 0x20f   : > { %3785 = vst [vmem:[%s6115_s11 + $0x38] sm:$0xff] %v3749_v43  ;;  %v3680_v16 = vadd.f32 %v4695_v33, %v6107_v49  ;;  %v4697_v14 = vadd.f32 %v4660_v62, %v6083_v24  ;;  %v3519_v63 = vpop.f32.mrb[11].mxu0 }
 0x210   : > { %3783 = vst [vmem:[%s6115_s11 + $0x28] sm:$0xff] %v3747_v1  ;;  %v3678_v57 = vadd.f32 %v4696_v51, %v6107_v49  ;;  %v4698_v9 = vadd.f32 %v3519_v63, %v6085_v0 }
 0x211   : > { %v3716_v17 = vmax.f32 %v3680_v16, 0.0  ;;  %v3681_v48 = vadd.f32 %v4697_v14, %v6107_v49 }
 0x212   : > { %v3714_v38 = vmax.f32 %v3678_v57, 0.0  ;;  %v3679_v60 = vadd.f32 %v4698_v9, %v6107_v49 }
 0x213   : > { %v3752_v7 = vmin.f32 %v3716_v17, 6.0  ;;  %v3717_v4 = vmax.f32 %v3681_v48, 0.0 }
 0x214   : > { %v3750_v11 = vmin.f32 %v3714_v38, 6.0  ;;  %v3715_v6 = vmax.f32 %v3679_v60, 0.0  ;;  %v4663_v24 = vpop.f32.mrb[12].mxu0 }
 0x215   : > { %3788 = vst [vmem:[%s6115_s11 + $0x50] sm:$0xff] %v3752_v7  ;;  %v3753_v12 = vmin.f32 %v3717_v4, 6.0  ;;  %v4699_v30 = vadd.f32 %v4663_v24, %v6087_v54  ;;  %v3532_v42 = vpop.f32.mrb[13].mxu0 }
 0x216   : > { %3786 = vst [vmem:[%s6115_s11 + $0x40] sm:$0xff] %v3750_v11  ;;  %v3751_v0 = vmin.f32 %v3715_v6, 6.0  ;;  %v4700_v46 = vadd.f32 %v3532_v42, %v6089_v31  ;;  %v4664_v50 = vpop.f32.mrb[14].mxu0 }
 0x217   : > { %3789 = vst [vmem:[%s6115_s11 + $0x58] sm:$0xff] %v3753_v12  ;;  %v3684_v47 = vadd.f32 %v4699_v30, %v6107_v49  ;;  %v4701_v37 = vadd.f32 %v4664_v50, %v6091_v56  ;;  %v3535_v18 = vpop.f32.mrb[15].mxu0 }
 0x218   : > { %3787 = vst [vmem:[%s6115_s11 + $0x48] sm:$0xff] %v3751_v0  ;;  %v3682_v10 = vadd.f32 %v4700_v46, %v6107_v49  ;;  %v4702_v25 = vadd.f32 %v3535_v18, %v6093_v13 }
 0x219   : > { %v4519_v52 = vpop.f32.mrb[20].mxu1  ;;  %v3720_v45 = vmax.f32 %v3684_v47, 0.0  ;;  %v3685_v22 = vadd.f32 %v4701_v37, %v6107_v49 }
 0x21a   : > { %v2050_v54 = vpop.f32.mrb[21].mxu1  ;;  %v3718_v23 = vmax.f32 %v3682_v10, 0.0  ;;  %v3683_v35 = vadd.f32 %v4702_v25, %v6107_v49 }
 0x21b   : > { %v4520_v31 = vpop.f32.mrb[22].mxu1  ;;  %v3756_v56 = vmin.f32 %v3720_v45, 6.0  ;;  %v3721_v26 = vmax.f32 %v3685_v22, 0.0 }
 0x21c   : > { %v2053_v53 = vpop.f32.mrb[23].mxu1  ;;  %v3754_v28 = vmin.f32 %v3718_v23, 6.0  ;;  %v3719_v41 = vmax.f32 %v3683_v35, 0.0  ;;  %v4667_v2 = vpop.f32.mrb[16].mxu0 }
 0x21d   : > { %3792 = vst [vmem:[%s6115_s11 + $0x70] sm:$0xff] %v3756_v56  ;;  %v3757_v27 = vmin.f32 %v3721_v26, 6.0  ;;  %v4703_v13 = vadd.f32 %v4667_v2, %v6095_v15  ;;  %v3548_v5 = vpop.f32.mrb[17].mxu0 }
 0x21e   : > { %3790 = vst [vmem:[%s6115_s11 + $0x60] sm:$0xff] %v3754_v28  ;;  %v3755_v32 = vmin.f32 %v3719_v41, 6.0  ;;  %v4704_v20 = vadd.f32 %v3548_v5, %v6097_v58  ;;  %v4668_v21 = vpop.f32.mrb[18].mxu0 }
 0x21f   : > { %3793 = vst [vmem:[%s6115_s11 + $0x78] sm:$0xff] %v3757_v27  ;;  %v3688_v44 = vadd.f32 %v4703_v13, %v6107_v49  ;;  %v4705_v55 = vadd.f32 %v4668_v21, %v6099_v8  ;;  %v3551_v40 = vpop.f32.mrb[19].mxu0 }
 0x220   : > { %3791 = vst [vmem:[%s6115_s11 + $0x68] sm:$0xff] %v3755_v32  ;;  %v3686_v39 = vadd.f32 %v4704_v20, %v6107_v49  ;;  %v4706_v29 = vadd.f32 %v3551_v40, %v6101_v34 }
 0x221   : > { %v4523_v59 = vpop.f32.mrb[24].mxu1  ;;  %v3724_v19 = vmax.f32 %v3688_v44, 0.0  ;;  %v3689_v36 = vadd.f32 %v4705_v55, %v6107_v49 }
 0x222   : > { %v2066_v15 = vpop.f32.mrb[25].mxu1  ;;  %v3722_v3 = vmax.f32 %v3686_v39, 0.0  ;;  %v3687_v43 = vadd.f32 %v4706_v29, %v6107_v49 }
 0x223   : > { %v4524_v58 = vpop.f32.mrb[26].mxu1  ;;  %v3760_v8 = vmin.f32 %v3724_v19, 6.0  ;;  %v3725_v61 = vmax.f32 %v3689_v36, 0.0 }
 0x224   : > { %v2069_v33 = vpop.f32.mrb[27].mxu1  ;;  %v3758_v1 = vmin.f32 %v3722_v3, 6.0  ;;  %v3723_v51 = vmax.f32 %v3687_v43, 0.0  ;;  %v4671_v62 = vpop.f32.mrb[20].mxu0 }
 0x225   : > { %3796 = vst [vmem:[%s6115_s11 + $0x90] sm:$0xff] %v3760_v8  ;;  %v3761_v16 = vmin.f32 %v3725_v61, 6.0  ;;  %v4707_v34 = vadd.f32 %v4671_v62, %v4519_v52  ;;  %v3564_v14 = vpop.f32.mrb[21].mxu0 }
 0x226   : > { %3794 = vst [vmem:[%s6115_s11 + $0x80] sm:$0xff] %v3758_v1  ;;  %v3759_v63 = vmin.f32 %v3723_v51, 6.0  ;;  %v4708_v57 = vadd.f32 %v3564_v14, %v2050_v54  ;;  %v4672_v9 = vpop.f32.mrb[22].mxu0 }
 0x227   : > { %3797 = vst [vmem:[%s6115_s11 + $0x98] sm:$0xff] %v3761_v16  ;;  %v3692_v17 = vadd.f32 %v4707_v34, %v6107_v49  ;;  %v4709_v48 = vadd.f32 %v4672_v9, %v4520_v31  ;;  %v3567_v38 = vpop.f32.mrb[23].mxu0 }
 0x228   : > { %3795 = vst [vmem:[%s6115_s11 + $0x88] sm:$0xff] %v3759_v63  ;;  %v3690_v7 = vadd.f32 %v4708_v57, %v6107_v49  ;;  %v4710_v4 = vadd.f32 %v3567_v38, %v2053_v53 }
 0x229   : > { %v4527_v60 = vpop.f32.mrb[28].mxu1  ;;  %v3728_v6 = vmax.f32 %v3692_v17, 0.0  ;;  %v3693_v24 = vadd.f32 %v4709_v48, %v6107_v49 }
 0x22a   : > { %v2082_v11 = vpop.f32.mrb[29].mxu1  ;;  %v3726_v30 = vmax.f32 %v3690_v7, 0.0  ;;  %v3691_v42 = vadd.f32 %v4710_v4, %v6107_v49 }
 0x22b   : > { %v4528_v12 = vpop.f32.mrb[30].mxu1  ;;  %v3764_v46 = vmin.f32 %v3728_v6, 6.0  ;;  %v3729_v50 = vmax.f32 %v3693_v24, 0.0 }
 0x22c   : > { %v2085_v0 = vpop.f32.mrb[31].mxu1  ;;  %v3762_v47 = vmin.f32 %v3726_v30, 6.0  ;;  %v3727_v37 = vmax.f32 %v3691_v42, 0.0  ;;  %v4675_v18 = vpop.f32.mrb[24].mxu0 }
 0x22d   : > { %3800 = vst [vmem:[%s6115_s11 + $0xb0] sm:$0xff] %v3764_v46  ;;  %v3765_v52 = vmin.f32 %v3729_v50, 6.0  ;;  %v4711_v10 = vadd.f32 %v4675_v18, %v4523_v59  ;;  %v3580_v25 = vpop.f32.mrb[25].mxu0 }
 0x22e   : > { %3798 = vst [vmem:[%s6115_s11 + $0xa0] sm:$0xff] %v3762_v47  ;;  %v3763_v54 = vmin.f32 %v3727_v37, 6.0  ;;  %v4712_v45 = vadd.f32 %v3580_v25, %v2066_v15  ;;  %v4676_v22 = vpop.f32.mrb[26].mxu0 }
 0x22f   : > { %3801 = vst [vmem:[%s6115_s11 + $0xb8] sm:$0xff] %v3765_v52  ;;  %v3696_v31 = vadd.f32 %v4711_v10, %v6107_v49  ;;  %v4713_v23 = vadd.f32 %v4676_v22, %v4524_v58  ;;  %v3583_v35 = vpop.f32.mrb[27].mxu0 }
 0x230   : > { %3799 = vst [vmem:[%s6115_s11 + $0xa8] sm:$0xff] %v3763_v54  ;;  %v3694_v56 = vadd.f32 %v4712_v45, %v6107_v49  ;;  %v4714_v26 = vadd.f32 %v3583_v35, %v2069_v33 }
 0x231   : > { %v4531_v53 = vpop.f32.mrb[32].mxu1  ;;  %v3732_v41 = vmax.f32 %v3696_v31, 0.0  ;;  %v3697_v2 = vadd.f32 %v4713_v23, %v6107_v49 }
 0x232   : > { %v2098_v28 = vpop.f32.mrb[33].mxu1  ;;  %v3730_v13 = vmax.f32 %v3694_v56, 0.0  ;;  %v3695_v5 = vadd.f32 %v4714_v26, %v6107_v49 }
 0x233   : > { %v4532_v27 = vpop.f32.mrb[34].mxu1  ;;  %v3768_v20 = vmin.f32 %v3732_v41, 6.0  ;;  %v3733_v21 = vmax.f32 %v3697_v2, 0.0 }
 0x234   : > { %v2101_v32 = vpop.f32.mrb[35].mxu1  ;;  %v3766_v44 = vmin.f32 %v3730_v13, 6.0  ;;  %v3731_v55 = vmax.f32 %v3695_v5, 0.0  ;;  %v4679_v40 = vpop.f32.mrb[28].mxu0 }
 0x235   : > { %3804 = vst [vmem:[%s6115_s11 + $0xd0] sm:$0xff] %v3768_v20  ;;  %v3769_v59 = vmin.f32 %v3733_v21, 6.0  ;;  %v4715_v39 = vadd.f32 %v4679_v40, %v4527_v60  ;;  %v3596_v29 = vpop.f32.mrb[29].mxu0 }
 0x236   : > { %3802 = vst [vmem:[%s6115_s11 + $0xc0] sm:$0xff] %v3766_v44  ;;  %v3767_v15 = vmin.f32 %v3731_v55, 6.0  ;;  %v4716_v19 = vadd.f32 %v3596_v29, %v2082_v11  ;;  %v4680_v36 = vpop.f32.mrb[30].mxu0 }
 0x237   : > { %3805 = vst [vmem:[%s6115_s11 + $0xd8] sm:$0xff] %v3769_v59  ;;  %v3700_v58 = vadd.f32 %v4715_v39, %v6107_v49  ;;  %v4717_v3 = vadd.f32 %v4680_v36, %v4528_v12  ;;  %v3599_v43 = vpop.f32.mrb[31].mxu0 }
 0x238   : > { %3803 = vst [vmem:[%s6115_s11 + $0xc8] sm:$0xff] %v3767_v15  ;;  %v3698_v33 = vadd.f32 %v4716_v19, %v6107_v49  ;;  %v4718_v8 = vadd.f32 %v3599_v43, %v2085_v0 }
 0x239   : > { %v3736_v61 = vmax.f32 %v3700_v58, 0.0  ;;  %v3701_v1 = vadd.f32 %v4717_v3, %v6107_v49 }
 0x23a   : > { %v3734_v51 = vmax.f32 %v3698_v33, 0.0  ;;  %v3699_v62 = vadd.f32 %v4718_v8, %v6107_v49 }
 0x23b   : > { %v3772_v16 = vmin.f32 %v3736_v61, 6.0  ;;  %v3737_v34 = vmax.f32 %v3701_v1, 0.0 }
 0x23c   : > { %v3770_v14 = vmin.f32 %v3734_v51, 6.0  ;;  %v3735_v63 = vmax.f32 %v3699_v62, 0.0  ;;  %v4683_v57 = vpop.f32.mrb[32].mxu0 }
 0x23d   : > { %3808 = vst [vmem:[%s6115_s11 + $0xf0] sm:$0xff] %v3772_v16  ;;  %v3773_v9 = vmin.f32 %v3737_v34, 6.0  ;;  %v4719_v17 = vadd.f32 %v4683_v57, %v4531_v53  ;;  %v3612_v48 = vpop.f32.mrb[33].mxu0 }
 0x23e   : > { %3806 = vst [vmem:[%s6115_s11 + $0xe0] sm:$0xff] %v3770_v14  ;;  %v3771_v38 = vmin.f32 %v3735_v63, 6.0  ;;  %v4720_v60 = vadd.f32 %v3612_v48, %v2098_v28  ;;  %v4684_v7 = vpop.f32.mrb[34].mxu0 }
 0x23f   : > { %3809 = vst [vmem:[%s6115_s11 + $0xf8] sm:$0xff] %v3773_v9  ;;  %v3704_v4 = vadd.f32 %v4719_v17, %v6107_v49  ;;  %v4721_v11 = vadd.f32 %v4684_v7, %v4532_v27  ;;  %v3615_v6 = vpop.f32.mrb[35].mxu0 }
 0x240   : > { %3807 = vst [vmem:[%s6115_s11 + $0xe8] sm:$0xff] %v3771_v38  ;;  %v3702_v24 = vadd.f32 %v4720_v60, %v6107_v49  ;;  %v4722_v12 = vadd.f32 %v3615_v6, %v2101_v32 }
 0x241   : > { %v3740_v30 = vmax.f32 %v3704_v4, 0.0  ;;  %v3705_v42 = vadd.f32 %v4721_v11, %v6107_v49 }
 0x242   : > { %v3738_v0 = vmax.f32 %v3702_v24, 0.0  ;;  %v3703_v46 = vadd.f32 %v4722_v12, %v6107_v49 }
 0x243   : > { %v3776_v50 = vmin.f32 %v3740_v30, 6.0  ;;  %v3741_v47 = vmax.f32 %v3705_v42, 0.0 }
 0x244   : > { %v3774_v37 = vmin.f32 %v3738_v0, 6.0  ;;  %v3739_v18 = vmax.f32 %v3703_v46, 0.0 }
 0x245   : > { %3812 = vst [vmem:[%s6115_s11 + $0x110] sm:$0xff] %v3776_v50  ;;  %v3777_v52 = vmin.f32 %v3741_v47, 6.0 }
 0x246   : > { %3810 = vst [vmem:[%s6115_s11 + $0x100] sm:$0xff] %v3774_v37  ;;  %v3775_v49 = vmin.f32 %v3739_v18, 6.0 }
 0x247   : > { %3813 = vst [vmem:[%s6115_s11 + $0x118] sm:$0xff] %v3777_v52 }
 0x248   : > { %3811 = vst [vmem:[%s6115_s11 + $0x108] sm:$0xff] %v3775_v49 }
 0x249   : > { %5131 = shalt.err (!%p5128_p5)
}
 0x24a   : > { %s5132_s4 = scalar_lea.hbm %s6198_s26, 4608  ;;  %s5136_s7 = scalar_lea.hbm %s6256_s3, 9216 }
 0x24b   : > { %p5133_p6 = scmp.ne.s32.totalorder %s6198_s26, %s5132_s4  ;;  %p5137_p10 = scmp.lt.u32.totalorder %s6198_s26, %s6256_s3 }
 0x24c   : > { %p5138_p11 = scmp.lt.u32.totalorder %s5136_s7, %s5132_s4  ;;  %p5140_p13 = scmp.lt.u32.totalorder %s5132_s4, %s6198_s26 }
 0x24d   : > { %p5134_p7 = pnand %p5133_p6, %p5261_p4 }
 0x24e   : > { %p5139_p12 = por %p5138_p11, %p5137_p10 }
 0x24f   : > { %p5135_p9 = pneg %p5134_p7 }
 0x250   : > { %p5141_p0 = por %p5140_p13, %p5139_p12 }
 0x252   : > { %p5142_p1 = pnand %p5141_p0, %p5135_p9 }
 0x254   : > { %5145 = shalt.err (!%p5142_p1)
}
 0x255   : > { %s5199_s10 = smov 128   ;;  %s5200_s11 = smov 8  }
 0x256   : > { %4988 = dma.vmem_to_hbm [thread:$0]  (%p5261_p4), %s6200_s19, 4608, %s6198_s26, %s6207_s15, %s5199_s10, %s5199_s10, %s5200_s11  }
 0x257 PF: > { %p4994_p2 = scmp.ge.s32.totalorder %s5196_s17, 2  ;;  %s3844_s18 = sand.u32 1, %s5176_s12  }
 0x258   : > { %s3845_s21 = scalar_lea.sflag [#allocation3], %s3844_s18 }
 0x259   : > { %p4991_p3 = pnand %p4994_p2, %p5268_p8 }
 0x25b   : > { %5171 = dma.done.wait (!%p4991_p3), %s3845_s21, 4608  }
 0x25c   : > { %5173 = vsyncadd (!%p4991_p3), %s3845_s21, 4294962688  ;;  %s16_s17 = sadd.s32 1, %s5196_s17   ;;  %s6259_s12 = smov %s5180_s13 }
 0x25d   : > { %p13_p5 = scmp.ge.s32.totalorder %s16_s17, 4   ;;  %s6260_s13 = smov %s5184_s14 }
 0x25e   : > { %s6261_s14 = smov %s5274_s25  ;;  %s6262_s15 = smov %s5192_s16 }
 0x25f   : > { %s6263_s16 = smov %s6265_s20  ;;  %15 = sbr.rel (!%p13_p5) target bundleno = 4 (0x4), region = 81 }
 0x266   :  { %3850 = vsyncpa [#allocation3], 1 }
 0x267   :  { %3852 = vsyncpa [#allocation3 + $0x1], 1 }

</bundles_post_ra>
